<compile_context>
chip_gen: v7x
topology: tpu7x:2x2x1
jax: 0.10.0
libtpu: 0.0.40
codegen_flags: <defaults>
</compile_context>

<pallas_src>
import functools

import numpy as np
import jax
import jax.numpy as jnp
from jax import lax
from jax.experimental import pallas as pl
from jax.experimental.pallas import tpu as pltpu

TILE_E = 128      # trust edges per grid step in the edge kernel
TILE_P = 128      # interactions per grid step in the prediction kernel
EPS = 1e-12


def _round_up(x, m):
    return (x + m - 1) // m * m


# -----------------------------------------------------------------------------
# Kernel 1: per trust-edge computation (gridded over edge tiles)
#   s      = (trust_e * trustee_e) / (||trust_e|| * ||trustee_e||)
#   a      = softmax(s @ key)
#   f      = trustee_e * (a @ mem)
#   beta   = relu([trust_e | f] @ [w1w; w3w] + (w1b + w3b + b)) @ h
# -----------------------------------------------------------------------------
def edge_kernel(trust_ref, trustee_ref, key_ref, mem_ref, wcat_ref, bias_ref,
                hw_ref, f_ref, beta_ref, cat_ref):
    trust = trust_ref[...]                       # (tile_E, D)
    trustee = trustee_ref[...]                   # (tile_E, D)
    D = trust.shape[1]

    # cosine-style per-edge scaling; rsqrt goes to the EUP (free VLIW slot).
    inv_norm = (lax.rsqrt(jnp.sum(trust * trust, axis=1, keepdims=True) + EPS) *
                lax.rsqrt(jnp.sum(trustee * trustee, axis=1, keepdims=True) + EPS))
    s = trust * trustee * inv_norm

    # memory attention (softmax over mem_size slots).
    logits = jnp.dot(s, key_ref[...], preferred_element_type=jnp.float32)
    m = jnp.max(logits, axis=1, keepdims=True)
    e = jnp.exp(logits - m)
    a = e * pl.reciprocal(jnp.sum(e, axis=1, keepdims=True), approx=True)
    f = trustee * jnp.dot(a, mem_ref[...], preferred_element_type=jnp.float32)

    # fused w1/w3: single (tile_E, 2D) @ (2D, A) matmul with one folded bias.
    cat_ref[:, :D] = trust
    cat_ref[:, D:] = f
    hidden = (jnp.dot(cat_ref[...], wcat_ref[...],
                      preferred_element_type=jnp.float32) + bias_ref[...])
    beta = jnp.dot(jnp.maximum(hidden, 0.0), hw_ref[...],
                   preferred_element_type=jnp.float32)

    f_ref[...] = f
    beta_ref[...] = beta


def edge_forward(trust_e, trustee_e, key_p, mem_p, wcat, bias, hw,
                 *, tile_e=TILE_E):
    E_pad, D = trust_e.shape
    M = key_p.shape[1]
    A = wcat.shape[1]
    grid = (E_pad // tile_e,)

    row = pl.BlockSpec((tile_e, D), lambda i: (i, 0))
    col = pl.BlockSpec((tile_e, 1), lambda i: (i, 0))

    def const(r, c):
        return pl.BlockSpec((r, c), lambda i: (0, 0))   # VMEM-resident weights

    flops = E_pad * (2 * D * M + 2 * M * D + 2 * (2 * D) * A + 2 * A + 12 * D)
    bytes_accessed = 4 * (3 * E_pad * D + E_pad + 2 * D * M + 2 * D * A + 2 * A)

    return pl.pallas_call(
        edge_kernel,
        grid=grid,
        in_specs=[row, row,
                  const(D, M), const(M, D),
                  const(2 * D, A), const(1, A), const(A, 1)],
        out_specs=(row, col),
        out_shape=(jax.ShapeDtypeStruct((E_pad, D), jnp.float32),
                   jax.ShapeDtypeStruct((E_pad, 1), jnp.float32)),
        scratch_shapes=[pltpu.VMEM((tile_e, 2 * D), jnp.float32)],
        compiler_params=pltpu.CompilerParams(
            dimension_semantics=("parallel",),
            vmem_limit_bytes=32 * 1024 * 1024),
        cost_estimate=pl.CostEstimate(flops=flops,
                                      transcendentals=E_pad * (M + 3),
                                      bytes_accessed=bytes_accessed),
    )(trust_e, trustee_e, key_p, mem_p, wcat, bias, hw)


# -----------------------------------------------------------------------------
# Kernel 2: per-user segment softmax over the (contiguous) trust edges of each
# user + weighted sum of f.  beta/f stay in HBM (pl.ANY); per user we DMA the
# [off, off+max_seg) slab into VMEM scratch and mask by the true segment length
# (scalar-prefetched offsets/lengths in SMEM).  Replaces the old dense (B, E)
# mask matmul.
# -----------------------------------------------------------------------------
def _agg_kernel(off_ref, len_ref, beta_hbm, f_hbm, out_ref, bbuf, fbuf, sem,
                *, max_seg):
    b = pl.program_id(0)
    off = off_ref[b]
    ln = len_ref[b]

    cp_b = pltpu.make_async_copy(beta_hbm.at[pl.ds(off, max_seg), :], bbuf,
                                 sem.at[0])
    cp_f = pltpu.make_async_copy(f_hbm.at[pl.ds(off, max_seg), :], fbuf,
                                 sem.at[1])
    cp_b.start()
    cp_f.start()
    cp_b.wait()
    cp_f.wait()

    valid = lax.broadcasted_iota(jnp.int32, (max_seg, 1), 0) < ln
    scores = jnp.where(valid, bbuf[...], -1e30)
    m = jnp.max(scores, axis=0, keepdims=True)
    e = jnp.where(valid, jnp.exp(scores - m), 0.0)
    denom = jnp.maximum(jnp.sum(e, axis=0, keepdims=True), 1e-30)
    att = e * pl.reciprocal(denom, approx=True)
    out_ref[...] = jnp.sum(att * fbuf[...], axis=0, keepdims=True)


def segment_aggregate(beta_col, f, seg_off, seg_len, max_seg):
    B = seg_off.shape[0]
    D = f.shape[1]
    kernel = functools.partial(_agg_kernel, max_seg=max_seg)
    flops = B * (2 * max_seg * D + 4 * max_seg)
    bytes_accessed = 4 * (B * max_seg * (D + 1) + B * D + 2 * B)
    return pl.pallas_call(
        kernel,
        out_shape=jax.ShapeDtypeStruct((B, D), jnp.float32),
        grid_spec=pltpu.PrefetchScalarGridSpec(
            num_scalar_prefetch=2,
            grid=(B,),
            in_specs=[pl.BlockSpec(memory_space=pl.ANY),   # beta (E_pad, 1)
                      pl.BlockSpec(memory_space=pl.ANY)],  # f    (E_pad, D)
            out_specs=pl.BlockSpec((1, D), lambda b, off, ln: (b, 0)),
            scratch_shapes=[pltpu.VMEM((max_seg, 1), jnp.float32),
                            pltpu.VMEM((max_seg, D), jnp.float32),
                            pltpu.SemaphoreType.DMA((2,))]),
        compiler_params=pltpu.CompilerParams(
            dimension_semantics=("arbitrary",)),
        cost_estimate=pl.CostEstimate(flops=flops,
                                      transcendentals=B * (max_seg + 1),
                                      bytes_accessed=bytes_accessed),
    )(seg_off, seg_len, beta_col, f)


# -----------------------------------------------------------------------------
# Kernel 3: prediction (training branch), pos + neg in one gridded pass
#   user_embed = friend_embed[user_idx] + userEmbed[uid[user_idx]]
#   pred_pos   = sum(user_embed * item_pos_embed, -1)
#   pred_neg   = sum(user_embed * item_neg_embed, -1)
# -----------------------------------------------------------------------------
def pred_kernel(friend_ref, user_ref, pos_ref, neg_ref, pp_ref, pn_ref):
    u = friend_ref[...] + user_ref[...]
    pp_ref[...] = jnp.sum(u * pos_ref[...], axis=1, keepdims=True)
    pn_ref[...] = jnp.sum(u * neg_ref[...], axis=1, keepdims=True)


def predict(friend_g, user_g, pos_e, neg_e, *, tile_p=TILE_P):
    P_pad, D = friend_g.shape
    row = pl.BlockSpec((tile_p, D), lambda i: (i, 0))
    col = pl.BlockSpec((tile_p, 1), lambda i: (i, 0))
    pp, pn = pl.pallas_call(
        pred_kernel,
        grid=(P_pad // tile_p,),
        in_specs=[row, row, row, row],
        out_specs=(col, col),
        out_shape=(jax.ShapeDtypeStruct((P_pad, 1), jnp.float32),
                   jax.ShapeDtypeStruct((P_pad, 1), jnp.float32)),
        compiler_params=pltpu.CompilerParams(
            dimension_semantics=("parallel",)),
    )(friend_g, user_g, pos_e, neg_e)
    return pp.reshape(-1), pn.reshape(-1)


# ------------------------------- full forward ---------------------------------
def samn_forward(params, trustid, trusteeid, seg_off, seg_len, max_seg,
                 user_idx, uid, item_pos_idx, item_neg_idx):
    (UE, IE, key_p, mem_p, w1w, w1b, w3w, w3b, b, hw) = params
    E = trustid.shape[0]
    P = user_idx.shape[0]
    # pad so every per-user DMA window [off, off+max_seg) stays in bounds.
    E_pad = _round_up(E + max_seg, TILE_E)
    P_pad = _round_up(P, TILE_P)

    # host/XLA glue: embedding gathers + zero padding.
    # TODO(synk): fuse these row gathers into the edge kernel as in-kernel DMA
    #             gathers from an ANY-space embedding table (avoids the HBM
    #             round-trip of the materialized trust_e / trustee_e copies).
    trust_e = jnp.pad(jnp.take(UE, trustid, axis=0), ((0, E_pad - E), (0, 0)))
    trustee_e = jnp.pad(jnp.take(UE, trusteeid, axis=0), ((0, E_pad - E), (0, 0)))

    # fold w1/w3 into one (2D, A) weight and a single bias.
    wcat = jnp.concatenate([w1w, w3w], axis=0)
    bias = w1b + w3b + b

    f, beta = edge_forward(trust_e, trustee_e, key_p, mem_p, wcat, bias, hw)
    friend = segment_aggregate(beta, f, seg_off, seg_len, max_seg)   # (B, D)

    friend_g = jnp.take(friend, user_idx, axis=0)
    user_g = jnp.take(UE, jnp.take(uid, user_idx), axis=0)
    pos_e = jnp.take(IE, item_pos_idx, axis=0)
    neg_e = jnp.take(IE, item_neg_idx, axis=0)
    pad = ((0, P_pad - P), (0, 0))
    pp, pn = predict(jnp.pad(friend_g, pad), jnp.pad(user_g, pad),
                     jnp.pad(pos_e, pad), jnp.pad(neg_e, pad))
    return pp[:P], pn[:P]


# ---------------------------- pure-JAX reference -------------------------------
def ref_forward(params, trustid, trusteeid, trust_num,
                user_idx, uid, item_pos_idx, item_neg_idx):
    (UE, IE, key_p, mem_p, w1w, w1b, w3w, w3b, b, hw) = params
    trust_e = UE[trustid]
    trustee_e = UE[trusteeid]
    norm = (jnp.linalg.norm(trust_e, axis=1, keepdims=True) *
            jnp.linalg.norm(trustee_e, axis=1, keepdims=True))
    s = trust_e * trustee_e / norm
    a = jax.nn.softmax(s @ key_p, axis=1)
    f = trustee_e * (a @ mem_p)
    beta = (jnp.maximum(trust_e @ w1w + w1b + f @ w3w + w3b + b, 0.0) @ hw).reshape(-1)
    segs, start = [], 0
    for n in trust_num:
        end = start + int(n)
        att = jax.nn.softmax(beta[start:end]).reshape(-1, 1)
        segs.append(jnp.sum(f[start:end] * att, axis=0))
        start = end
    friend = jnp.stack(segs)
    user_embed = friend[user_idx] + UE[uid[user_idx]]
    pp = jnp.sum(user_embed * IE[item_pos_idx], axis=1)
    pn = jnp.sum(user_embed * IE[item_neg_idx], axis=1)
    return pp, pn


# ------------------------------------ main -------------------------------------
if __name__ == "__main__":
    # small synthetic problem
    userNum, itemNum = 12, 20
    hide_dim, mem_size, att_size = 32, 8, 16

    rng = np.random.RandomState(0)
    uid = np.array([1, 4, 7, 9], dtype=np.int32)             # batch of users
    B = uid.shape[0]
    trust_num = np.array([3, 2, 4, 3], dtype=np.int32)       # trust edges / user
    E = int(trust_num.sum())
    seg_ids = np.repeat(np.arange(B), trust_num)
    trustid = uid[seg_ids].astype(np.int32)                  # truster (global id)
    trusteeid = rng.randint(0, userNum, size=E).astype(np.int32)

    inter_num = np.array([3, 2, 3, 2], dtype=np.int32)       # interactions / user
    P = int(inter_num.sum())
    user_idx = np.repeat(np.arange(B), inter_num).astype(np.int32)
    item_pos_idx = rng.randint(0, itemNum, size=P).astype(np.int32)
    # TODO(synk): true rejection-sampled negSample against a sparse trainMat is
    # host-side data prep; a deterministic collision-free stand-in is used here.
    item_neg_idx = ((item_pos_idx + 1 + rng.randint(0, itemNum - 1, size=P))
                    % itemNum).astype(np.int32)

    # contiguous-segment metadata (replaces the old dense (B, E) mask)
    seg_off = np.concatenate([[0], np.cumsum(trust_num)[:-1]]).astype(np.int32)
    seg_len = trust_num.astype(np.int32)
    max_seg = int(_round_up(int(trust_num.max()), 8))

    # ---------------- deterministic parameter init (xavier normal) -------------
    def xavier(k, shape):
        std = float(np.sqrt(2.0 / (shape[0] + shape[1])))
        return std * jax.random.normal(k, shape, dtype=jnp.float32)

    keys = jax.random.split(jax.random.PRNGKey(0), 8)
    UE = xavier(keys[0], (userNum, hide_dim))                 # userEmbed.weight
    IE = xavier(keys[1], (itemNum, hide_dim))                 # itemEmbed.weight
    key_p = xavier(keys[2], (hide_dim, mem_size))             # self.key
    mem_p = xavier(keys[3], (mem_size, hide_dim))             # self.mem
    w1w = xavier(keys[4], (hide_dim, att_size))               # w1.weight (pre-T)
    w1b = 0.01 * jax.random.normal(keys[5], (1, att_size), dtype=jnp.float32)
    w3w = xavier(keys[6], (hide_dim, att_size))               # w3.weight (pre-T)
    w3b = 0.01 * jax.random.normal(keys[7], (1, att_size), dtype=jnp.float32)
    b = jnp.zeros((1, att_size), dtype=jnp.float32)           # self.b
    hw = xavier(jax.random.PRNGKey(42), (att_size, 1))        # h.weight (pre-T)

    params = (UE, IE, key_p, mem_p, w1w, w1b, w3w, w3b, b, hw)

    pred_pos, pred_neg = samn_forward(
        params, jnp.asarray(trustid), jnp.asarray(trusteeid),
        jnp.asarray(seg_off), jnp.asarray(seg_len), max_seg,
        jnp.asarray(user_idx), jnp.asarray(uid),
        jnp.asarray(item_pos_idx), jnp.asarray(item_neg_idx))
    jax.block_until_ready((pred_pos, pred_neg))

    # correctness check against the pure-JAX reference (tolerance loosened a bit
    # because softmax denominators use the approximate EUP reciprocal).
    rp, rn = ref_forward(params, jnp.asarray(trustid), jnp.asarray(trusteeid),
                         trust_num, jnp.asarray(user_idx), jnp.asarray(uid),
                         jnp.asarray(item_pos_idx), jnp.asarray(item_neg_idx))
    np.testing.assert_allclose(np.asarray(pred_pos), np.asarray(rp),
                               rtol=5e-3, atol=5e-3)
    np.testing.assert_allclose(np.asarray(pred_neg), np.asarray(rn),
                               rtol=5e-3, atol=5e-3)

    print("KERNEL_OK")
</pallas_src>

<mosaic_0001>
module attributes {stable_mosaic.version = 11 : i64} {
  func.func @edge_kernel(%arg0: i32, %arg1: memref<128x32xf32, #tpu.memory_space<vmem>>, %arg2: memref<128x32xf32, #tpu.memory_space<vmem>>, %arg3: memref<32x8xf32, #tpu.memory_space<vmem>>, %arg4: memref<8x32xf32, #tpu.memory_space<vmem>>, %arg5: memref<64x16xf32, #tpu.memory_space<vmem>>, %arg6: memref<1x16xf32, #tpu.memory_space<vmem>>, %arg7: memref<16x1xf32, #tpu.memory_space<vmem>>, %arg8: memref<128x32xf32, #tpu.memory_space<vmem>>, %arg9: memref<128x1xf32, #tpu.memory_space<vmem>>, %arg10: memref<128x64xf32, #tpu.memory_space<vmem>>) attributes {dimension_semantics = [#tpu.dimension_semantics<parallel>], iteration_bounds = array<i64: 1>, scalar_prefetch = 0 : i64, scratch_operands = 1 : i64, tpu.core_type = #tpu.core_type<tc>, window_params = [{transform_indices = @transform_0, window_bounds = array<i64: 128, 32>}, {transform_indices = @transform_1, window_bounds = array<i64: 128, 32>}, {pipeline_mode = #tpu.pipeline_mode<synchronous>, transform_indices = @transform_2, window_bounds = array<i64: 32, 8>}, {pipeline_mode = #tpu.pipeline_mode<synchronous>, transform_indices = @transform_3, window_bounds = array<i64: 8, 32>}, {pipeline_mode = #tpu.pipeline_mode<synchronous>, transform_indices = @transform_4, window_bounds = array<i64: 64, 16>}, {pipeline_mode = #tpu.pipeline_mode<synchronous>, transform_indices = @transform_5, window_bounds = array<i64: 1, 16>}, {pipeline_mode = #tpu.pipeline_mode<synchronous>, transform_indices = @transform_6, window_bounds = array<i64: 16, 1>}, {transform_indices = @transform_7, window_bounds = array<i64: 128, 32>}, {transform_indices = @transform_8, window_bounds = array<i64: 128, 1>}]} {
    %c0 = arith.constant 0 : index
    %c0_0 = arith.constant 0 : index
    %0 = vector.load %arg1[%c0, %c0_0] : memref<128x32xf32, #tpu.memory_space<vmem>>, vector<128x32xf32>
    %c0_1 = arith.constant 0 : index
    %c0_2 = arith.constant 0 : index
    %1 = vector.load %arg2[%c0_1, %c0_2] : memref<128x32xf32, #tpu.memory_space<vmem>>, vector<128x32xf32>
    %2 = arith.mulf %0, %0 : vector<128x32xf32>
    %cst = arith.constant dense<0.000000e+00> : vector<128xf32>
    %3 = vector.multi_reduction <add>, %2, %cst [1] : vector<128x32xf32> to vector<128xf32>
    %4 = vector.shape_cast %3 : vector<128xf32> to vector<128x1xf32>
    %cst_3 = arith.constant 9.99999996E-13 : f32
    %5 = vector.broadcast %cst_3 : f32 to vector<128x1xf32>
    %6 = arith.addf %4, %5 : vector<128x1xf32>
    %7 = math.rsqrt %6 : vector<128x1xf32>
    %8 = arith.mulf %1, %1 : vector<128x32xf32>
    %cst_4 = arith.constant dense<0.000000e+00> : vector<128xf32>
    %9 = vector.multi_reduction <add>, %8, %cst_4 [1] : vector<128x32xf32> to vector<128xf32>
    %10 = vector.shape_cast %9 : vector<128xf32> to vector<128x1xf32>
    %cst_5 = arith.constant 9.99999996E-13 : f32
    %11 = vector.broadcast %cst_5 : f32 to vector<128x1xf32>
    %12 = arith.addf %10, %11 : vector<128x1xf32>
    %13 = math.rsqrt %12 : vector<128x1xf32>
    %14 = arith.mulf %7, %13 : vector<128x1xf32>
    %15 = arith.mulf %0, %1 : vector<128x32xf32>
    %16 = vector.broadcast %14 : vector<128x1xf32> to vector<128x32xf32>
    %17 = arith.mulf %15, %16 : vector<128x32xf32>
    %c0_6 = arith.constant 0 : index
    %c0_7 = arith.constant 0 : index
    %18 = vector.load %arg3[%c0_6, %c0_7] : memref<32x8xf32, #tpu.memory_space<vmem>>, vector<32x8xf32>
    %cst_8 = arith.constant dense<0.000000e+00> : vector<128x8xf32>
    %19 = tpu.matmul %17, %18, %cst_8 {dimension_numbers = #tpu.dot_dimension_numbers<[1], [0], [0], [1], [0, 0, 1, 1], [], []>} : vector<128x32xf32>, vector<32x8xf32>, vector<128x8xf32> -> vector<128x8xf32>
    %cst_9 = arith.constant dense<0xFF800000> : vector<128xf32>
    %20 = vector.multi_reduction <maximumf>, %19, %cst_9 [1] : vector<128x8xf32> to vector<128xf32>
    %21 = vector.shape_cast %20 : vector<128xf32> to vector<128x1xf32>
    %22 = vector.broadcast %21 : vector<128x1xf32> to vector<128x8xf32>
    %23 = arith.subf %19, %22 : vector<128x8xf32>
    %24 = math.exp %23 : vector<128x8xf32>
    %cst_10 = arith.constant dense<0.000000e+00> : vector<128xf32>
    %25 = vector.multi_reduction <add>, %24, %cst_10 [1] : vector<128x8xf32> to vector<128xf32>
    %26 = vector.shape_cast %25 : vector<128xf32> to vector<128x1xf32>
    %27 = tpu.reciprocal %26 {approx = true} : vector<128x1xf32> -> vector<128x1xf32>
    %28 = vector.broadcast %27 : vector<128x1xf32> to vector<128x8xf32>
    %29 = arith.mulf %24, %28 : vector<128x8xf32>
    %c0_11 = arith.constant 0 : index
    %c0_12 = arith.constant 0 : index
    %30 = vector.load %arg4[%c0_11, %c0_12] : memref<8x32xf32, #tpu.memory_space<vmem>>, vector<8x32xf32>
    %cst_13 = arith.constant dense<0.000000e+00> : vector<128x32xf32>
    %31 = tpu.matmul %29, %30, %cst_13 {dimension_numbers = #tpu.dot_dimension_numbers<[1], [0], [0], [1], [0, 0, 1, 1], [], []>} : vector<128x8xf32>, vector<8x32xf32>, vector<128x32xf32> -> vector<128x32xf32>
    %32 = arith.mulf %1, %31 : vector<128x32xf32>
    %c0_14 = arith.constant 0 : index
    %c0_15 = arith.constant 0 : index
    %33 = vector.load %arg10[%c0_14, %c0_15] : memref<128x64xf32, #tpu.memory_space<vmem>>, vector<128x32xf32>
    tpu.vector_store %arg10[%c0_14, %c0_15], %0 {strides = array<i32>} : memref<128x64xf32, #tpu.memory_space<vmem>>, vector<128x32xf32>,
    %c0_16 = arith.constant 0 : index
    %c32 = arith.constant 32 : index
    %34 = vector.load %arg10[%c0_16, %c32] : memref<128x64xf32, #tpu.memory_space<vmem>>, vector<128x32xf32>
    tpu.vector_store %arg10[%c0_16, %c32], %32 {strides = array<i32>} : memref<128x64xf32, #tpu.memory_space<vmem>>, vector<128x32xf32>,
    %c0_17 = arith.constant 0 : index
    %c0_18 = arith.constant 0 : index
    %35 = vector.load %arg10[%c0_17, %c0_18] : memref<128x64xf32, #tpu.memory_space<vmem>>, vector<128x64xf32>
    %c0_19 = arith.constant 0 : index
    %c0_20 = arith.constant 0 : index
    %36 = vector.load %arg5[%c0_19, %c0_20] : memref<64x16xf32, #tpu.memory_space<vmem>>, vector<64x16xf32>
    %cst_21 = arith.constant dense<0.000000e+00> : vector<128x16xf32>
    %37 = tpu.matmul %35, %36, %cst_21 {dimension_numbers = #tpu.dot_dimension_numbers<[1], [0], [0], [1], [0, 0, 1, 1], [], []>} : vector<128x64xf32>, vector<64x16xf32>, vector<128x16xf32> -> vector<128x16xf32>
    %c0_22 = arith.constant 0 : index
    %c0_23 = arith.constant 0 : index
    %38 = vector.load %arg6[%c0_22, %c0_23] : memref<1x16xf32, #tpu.memory_space<vmem>>, vector<1x16xf32>
    %39 = vector.broadcast %38 : vector<1x16xf32> to vector<128x16xf32>
    %40 = arith.addf %37, %39 : vector<128x16xf32>
    %cst_24 = arith.constant 0.000000e+00 : f32
    %41 = vector.broadcast %cst_24 : f32 to vector<128x16xf32>
    %42 = arith.maximumf %40, %41 : vector<128x16xf32>
    %c0_25 = arith.constant 0 : index
    %c0_26 = arith.constant 0 : index
    %43 = vector.load %arg7[%c0_25, %c0_26] : memref<16x1xf32, #tpu.memory_space<vmem>>, vector<16x1xf32>
    %cst_27 = arith.constant dense<0.000000e+00> : vector<128x1xf32>
    %44 = tpu.matmul %42, %43, %cst_27 {dimension_numbers = #tpu.dot_dimension_numbers<[1], [0], [0], [1], [0, 0, 1, 1], [], []>} : vector<128x16xf32>, vector<16x1xf32>, vector<128x1xf32> -> vector<128x1xf32>
    %c0_28 = arith.constant 0 : index
    %c0_29 = arith.constant 0 : index
    %45 = vector.load %arg8[%c0_28, %c0_29] : memref<128x32xf32, #tpu.memory_space<vmem>>, vector<128x32xf32>
    tpu.vector_store %arg8[%c0_28, %c0_29], %32 {strides = array<i32>} : memref<128x32xf32, #tpu.memory_space<vmem>>, vector<128x32xf32>,
    %c0_30 = arith.constant 0 : index
    %c0_31 = arith.constant 0 : index
    %46 = vector.load %arg9[%c0_30, %c0_31] : memref<128x1xf32, #tpu.memory_space<vmem>>, vector<128x1xf32>
    tpu.vector_store %arg9[%c0_30, %c0_31], %44 {strides = array<i32>} : memref<128x1xf32, #tpu.memory_space<vmem>>, vector<128x1xf32>,
    return
  }
  func.func @transform_0(%arg0: i32) -> (i32, i32) {
    %c0_i32 = arith.constant 0 : i32
    %c0_i32_0 = arith.constant 0 : i32
    return %arg0, %c0_i32 : i32, i32
  }
  func.func @transform_1(%arg0: i32) -> (i32, i32) {
    %c0_i32 = arith.constant 0 : i32
    %c0_i32_0 = arith.constant 0 : i32
    return %arg0, %c0_i32 : i32, i32
  }
  func.func @transform_2(%arg0: i32) -> (i32, i32) {
    %c0_i32 = arith.constant 0 : i32
    %c0_i32_0 = arith.constant 0 : i32
    %c0_i32_1 = arith.constant 0 : i32
    return %c0_i32, %c0_i32_0 : i32, i32
  }
  func.func @transform_3(%arg0: i32) -> (i32, i32) {
    %c0_i32 = arith.constant 0 : i32
    %c0_i32_0 = arith.constant 0 : i32
    %c0_i32_1 = arith.constant 0 : i32
    return %c0_i32, %c0_i32_0 : i32, i32
  }
  func.func @transform_4(%arg0: i32) -> (i32, i32) {
    %c0_i32 = arith.constant 0 : i32
    %c0_i32_0 = arith.constant 0 : i32
    %c0_i32_1 = arith.constant 0 : i32
    return %c0_i32, %c0_i32_0 : i32, i32
  }
  func.func @transform_5(%arg0: i32) -> (i32, i32) {
    %c0_i32 = arith.constant 0 : i32
    %c0_i32_0 = arith.constant 0 : i32
    %c0_i32_1 = arith.constant 0 : i32
    return %c0_i32, %c0_i32_0 : i32, i32
  }
  func.func @transform_6(%arg0: i32) -> (i32, i32) {
    %c0_i32 = arith.constant 0 : i32
    %c0_i32_0 = arith.constant 0 : i32
    %c0_i32_1 = arith.constant 0 : i32
    return %c0_i32, %c0_i32_0 : i32, i32
  }
  func.func @transform_7(%arg0: i32) -> (i32, i32) {
    %c0_i32 = arith.constant 0 : i32
    %c0_i32_0 = arith.constant 0 : i32
    return %arg0, %c0_i32 : i32, i32
  }
  func.func @transform_8(%arg0: i32) -> (i32, i32) {
    %c0_i32 = arith.constant 0 : i32
    %c0_i32_0 = arith.constant 0 : i32
    return %arg0, %c0_i32 : i32, i32
  }
}

</mosaic_0001>

<bundles_post_ra>
// kernel: tpu_custom_call.1
= control target key start
LH: loop header
LB: loop body
LE: loop exit
PB: predicated region body
PF: predicated region fallthrough
CT: control target
= control target key end

     0   :  { %vm76_vm0 = vcmask 261120   ;;  %vm498_vm1 = vcmask 64512   ;;  %s1903_s28 = smov 32   ;;  %vm965_vm2 = vcmask 523520   ;;  %vm1013_vm3 = vcmask 523264   ;;  %s2725_s0 = inlined_call_operand.vmem [shape: f32[128,32], index: 0, kind: input, shape index: {}]   ;;  %s2726_s1 = inlined_call_operand.vmem [shape: f32[128,32], index: 1, kind: input, shape index: {}]   ;;  %s2727_s2 = inlined_call_operand.vmem [shape: f32[32,8], index: 2, kind: input, shape index: {}]   ;;  %s2728_s3 = inlined_call_operand.vmem [shape: f32[8,32], index: 3, kind: input, shape index: {}]   ;;  %s2729_s4 = inlined_call_operand.vmem [shape: f32[64,16], index: 4, kind: input, shape index: {}]   ;;  %s2730_s7 = inlined_call_operand.vmem [shape: f32[128,32], index: 7, kind: output, shape index: {0}]   ;;  %s2731_s6 = inlined_call_operand.vmem [shape: f32[16,1], index: 6, kind: input, shape index: {}]   ;;  %s2732_s5 = inlined_call_operand.vmem [shape: f32[1,16], index: 5, kind: input, shape index: {}]   ;;  %s2733_s8 = inlined_call_operand.vmem [shape: f32[128,1], index: 8, kind: output, shape index: {1}]  }
   0x1   :  { %v1952_v0 = vld [vmem:[%s2725_s0 + $0x8] sm:$0xff]  ;;  %v1957_v1 = vld [vmem:[%s2725_s0] sm:$0xff]  ;;  %v1982_v7 = vld [vmem:[%s2725_s0 + $0x10] sm:$0xff]  ;;  %vm1225_vm4 = vcmask 130048   ;;  %vm1435_vm5 = vcmask 7168  }
   0x2   :  { %v1962_v2 = vld [vmem:[%s2726_s1 + $0x8] sm:$0xff]  ;;  %v61_v3 = vmul.f32 %v1952_v0, %v1952_v0  ;;  %886 = vst.msk [vmem:[#allocation2 + $0x8] sm:$0xff] %vm76_vm0, %v1952_v0  ;;  %v60_v4 = vmul.f32 %v1957_v1, %v1957_v1  ;;  %885 = vst.msk [vmem:[#allocation2] sm:$0xff] %vm76_vm0, %v1957_v1  ;;  %v1977_v6 = vld [vmem:[%s2726_s1] sm:$0xff]  ;;  %v62_v19 = vmul.f32 %v1982_v7, %v1982_v7 }
   0x3   :  { %v158_v5 = vmul.f32 %v1962_v2, %v1962_v2  ;;  %v157_v8 = vmul.f32 %v1977_v6, %v1977_v6  ;;  %v1989_v9 = vld [vmem:[%s2726_s1 + $0x10] sm:$0xff]  ;;  %887 = vst.msk [vmem:[#allocation2 + $0x10] sm:$0xff] %vm76_vm0, %v1982_v7  ;;  %v1996_v10 = vld [vmem:[%s2725_s0 + $0x18] sm:$0xff]  ;;  %v2005_v13 = vld [vmem:[%s2725_s0 + $0x20] sm:$0xff] }
   0x4   :  { %v80_v11 = vsel %vm76_vm0, %v61_v3, 0.0  ;;  %v77_v12 = vsel %vm76_vm0, %v60_v4, 0.0  ;;  %888 = vst.msk [vmem:[#allocation2 + $0x18] sm:$0xff] %vm76_vm0, %v1996_v10  ;;  %v2010_v14 = vld [vmem:[%s2725_s0 + $0x28] sm:$0xff]  ;;  %889 = vst.msk [vmem:[#allocation2 + $0x20] sm:$0xff] %vm76_vm0, %v2005_v13  ;;  %v2019_v15 = vld [vmem:[%s2725_s0 + $0x30] sm:$0xff]  ;;  %v159_v18 = vmul.f32 %v1989_v9, %v1989_v9  ;;  %v63_v30 = vmul.f32 %v1996_v10, %v1996_v10 }
   0x5   :  { %81 = vadd.xlane.f32.xlu1 %v80_v11  ;;  %78 = vadd.xlane.f32.xlu0 %v77_v12  ;;  %890 = vst.msk [vmem:[#allocation2 + $0x28] sm:$0xff] %vm76_vm0, %v2010_v14  ;;  %v176_v16 = vsel %vm76_vm0, %v158_v5, 0.0  ;;  %v173_v17 = vsel %vm76_vm0, %v157_v8, 0.0  ;;  %891 = vst.msk [vmem:[#allocation2 + $0x30] sm:$0xff] %vm76_vm0, %v2019_v15  ;;  %v2032_v20 = vld [vmem:[%s2725_s0 + $0x38] sm:$0xff]  ;;  %v2037_v21 = vld [vmem:[%s2725_s0 + $0x40] sm:$0xff]  ;;  %v64_v38 = vmul.f32 %v2005_v13, %v2005_v13 }
   0x6   :  { %v2042_v22 = vld [vmem:[%s2726_s1 + $0x18] sm:$0xff]  ;;  %892 = vst.msk [vmem:[#allocation2 + $0x38] sm:$0xff] %vm76_vm0, %v2032_v20  ;;  %893 = vst.msk [vmem:[#allocation2 + $0x40] sm:$0xff] %vm76_vm0, %v2037_v21  ;;  %v2051_v23 = vld [vmem:[%s2725_s0 + $0x48] sm:$0xff]  ;;  %v179_v27 = vsel %vm76_vm0, %v159_v18, 0.0  ;;  %v83_v28 = vsel %vm76_vm0, %v62_v19, 0.0  ;;  %v65_v43 = vmul.f32 %v2010_v14, %v2010_v14  ;;  %v66_v48 = vmul.f32 %v2019_v15, %v2019_v15 }
   0x7   :  { %894 = vst.msk [vmem:[#allocation2 + $0x48] sm:$0xff] %vm76_vm0, %v2051_v23  ;;  %v2058_v24 = vld [vmem:[%s2725_s0 + $0x50] sm:$0xff]  ;;  %v2063_v25 = vld [vmem:[%s2725_s0 + $0x58] sm:$0xff]  ;;  %v2072_v26 = vld [vmem:[%s2725_s0 + $0x60] sm:$0xff]  ;;  %v160_v29 = vmul.f32 %v2042_v22, %v2042_v22  ;;  %v86_v36 = vsel %vm76_vm0, %v63_v30, 0.0  ;;  %v89_v41 = vsel %vm76_vm0, %v64_v38, 0.0  ;;  %v67_v53 = vmul.f32 %v2032_v20, %v2032_v20 }
   0x8   :  { %895 = vst.msk [vmem:[#allocation2 + $0x50] sm:$0xff] %vm76_vm0, %v2058_v24  ;;  %896 = vst.msk [vmem:[#allocation2 + $0x58] sm:$0xff] %vm76_vm0, %v2063_v25  ;;  %v2085_v31 = vld [vmem:[%s2725_s0 + $0x68] sm:$0xff]  ;;  %v2090_v32 = vld [vmem:[%s2725_s0 + $0x70] sm:$0xff]  ;;  %v92_v46 = vsel %vm76_vm0, %v65_v43, 0.0  ;;  %v95_v51 = vsel %vm76_vm0, %v66_v48, 0.0  ;;  %v68_v58 = vmul.f32 %v2037_v21, %v2037_v21  ;;  %v69_v5 = vmul.f32 %v2051_v23, %v2051_v23 }
   0x9   :  { %177 = vadd.xlane.f32.xlu1 %v176_v16  ;;  %174 = vadd.xlane.f32.xlu0 %v173_v17  ;;  %897 = vst.msk [vmem:[#allocation2 + $0x60] sm:$0xff] %vm76_vm0, %v2072_v26  ;;  %v2095_v33 = vld [vmem:[%s2726_s1 + $0x20] sm:$0xff]  ;;  %898 = vst.msk [vmem:[#allocation2 + $0x68] sm:$0xff] %vm76_vm0, %v2085_v31  ;;  %v2104_v34 = vld [vmem:[%s2725_s0 + $0x78] sm:$0xff]  ;;  %v182_v35 = vsel %vm76_vm0, %v160_v29, 0.0  ;;  %v98_v56 = vsel %vm76_vm0, %v67_v53, 0.0  ;;  %v73_v48 = vmul.f32 %v2085_v31, %v2085_v31 }
   0xa   :  { %899 = vst.msk [vmem:[#allocation2 + $0x70] sm:$0xff] %vm76_vm0, %v2090_v32  ;;  %900 = vst.msk [vmem:[#allocation2 + $0x78] sm:$0xff] %vm76_vm0, %v2104_v34  ;;  %v161_v37 = vmul.f32 %v2095_v33, %v2095_v33  ;;  %v2117_v39 = vld [vmem:[%s2726_s1 + $0x28] sm:$0xff]  ;;  %v2128_v44 = vld [vmem:[%s2726_s1 + $0x30] sm:$0xff]  ;;  %v101_v3 = vsel %vm76_vm0, %v68_v58, 0.0  ;;  %v104_v18 = vsel %vm76_vm0, %v69_v5, 0.0 }
   0xb   :  { %v162_v42 = vmul.f32 %v2117_v39, %v2117_v39  ;;  %v163_v47 = vmul.f32 %v2128_v44, %v2128_v44  ;;  %v2139_v49 = vld [vmem:[%s2726_s1 + $0x38] sm:$0xff]  ;;  %v2150_v54 = vld [vmem:[%s2726_s1 + $0x40] sm:$0xff]  ;;  %v2161_v59 = vld [vmem:[%s2726_s1 + $0x48] sm:$0xff] }
   0xc   :  { %v185_v40 = vsel %vm76_vm0, %v161_v37, 0.0  ;;  %v164_v52 = vmul.f32 %v2139_v49, %v2139_v49  ;;  %v165_v57 = vmul.f32 %v2150_v54, %v2150_v54  ;;  %v301_v60 = vld [vmem:[%s2727_s2] sm:$0xff]  ;;  %v302_v61 = vld [vmem:[%s2727_s2 + $0x8] sm:$0xff]  ;;  %v166_v4 = vmul.f32 %v2161_v59, %v2161_v59  ;;  %v2178_v8 = vld [vmem:[%s2726_s1 + $0x50] sm:$0xff] }
   0xd   :  { %180 = vadd.xlane.f32.xlu1 %v179_v27  ;;  %84 = vadd.xlane.f32.xlu0 %v83_v28  ;;  %v188_v45 = vsel %vm76_vm0, %v162_v42, 0.0  ;;  %v191_v50 = vsel %vm76_vm0, %v163_v47, 0.0  ;;  %v1730_v62 = vpack.c.bf16 %v302_v61, %v301_v60  ;;  %v303_v11 = vld [vmem:[%s2727_s2 + $0x10] sm:$0xff]  ;;  %v304_v12 = vld [vmem:[%s2727_s2 + $0x18] sm:$0xff]  ;;  %v167_v19 = vmul.f32 %v2178_v8, %v2178_v8  ;;  %v2206_v37 = vld [vmem:[%s2726_s1 + $0x60] sm:$0xff] }
   0xe   :  { %v194_v55 = vsel %vm76_vm0, %v164_v52, 0.0  ;;  %v197_v63 = vsel %vm76_vm0, %v165_v57, 0.0  ;;  %v1734_v16 = vpack.c.bf16 %v304_v12, %v303_v11  ;;  %v200_v17 = vsel %vm76_vm0, %v166_v4, 0.0  ;;  %v2195_v28 = vld [vmem:[%s2726_s1 + $0x58] sm:$0xff]  ;;  %v2217_v43 = vld [vmem:[%s2726_s1 + $0x68] sm:$0xff] }
   0xf   :  { %1731 = vmatprep.subr.bf16.mxu0 %v1730_v62  ;;  %v70_v27 = vmul.f32 %v2058_v24, %v2058_v24  ;;  %v203_v29 = vsel %vm76_vm0, %v167_v19, 0.0  ;;  %v72_v42 = vmul.f32 %v2072_v26, %v2072_v26  ;;  %v170_v47 = vmul.f32 %v2217_v43, %v2217_v43 }
  0x10   :  { %1733 = vmatpush3.bf16.msra.mxu0 %v1730_v62  ;;  %v116_v52 = vsel %vm76_vm0, %v73_v48, 0.0  ;;  %v75_v61 = vmul.f32 %v2104_v34, %v2104_v34 }
  0x11   :  { %183 = vadd.xlane.f32.xlu1 %v182_v35  ;;  %87 = vadd.xlane.f32.xlu0 %v86_v36  ;;  %v107_v30 = vsel %vm76_vm0, %v70_v27, 0.0  ;;  %v168_v35 = vmul.f32 %v2195_v28, %v2195_v28  ;;  %v71_v36 = vmul.f32 %v2063_v25, %v2063_v25 }
  0x12   :  { %1735 = vmatprep.subr.bf16.mxu0 %v1734_v16 }
  0x13   :  { %v206_v38 = vsel %vm76_vm0, %v168_v35, 0.0 }
  0x14   :  { %1737 = vmatpush3.bf16.msra.mxu0 %v1734_v16 }
  0x15   :  { %186 = vadd.xlane.f32.xlu1 %v185_v40  ;;  %90 = vadd.xlane.f32.xlu0 %v89_v41  ;;  %v110_v40 = vsel %vm76_vm0, %v71_v36, 0.0  ;;  %v169_v41 = vmul.f32 %v2206_v37, %v2206_v37 }
  0x19   :  { %189 = vadd.xlane.f32.xlu1 %v188_v45  ;;  %93 = vadd.xlane.f32.xlu0 %v92_v46  ;;  %v209_v45 = vsel %vm76_vm0, %v169_v41, 0.0  ;;  %v113_v46 = vsel %vm76_vm0, %v72_v42, 0.0 }
  0x1d   :  { %192 = vadd.xlane.f32.xlu1 %v191_v50  ;;  %96 = vadd.xlane.f32.xlu0 %v95_v51  ;;  %v2228_v50 = vld [vmem:[%s2726_s1 + $0x70] sm:$0xff]  ;;  %v212_v51 = vsel %vm76_vm0, %v170_v47, 0.0 }
  0x1e   :  { %v171_v53 = vmul.f32 %v2228_v50, %v2228_v50 }
  0x20   :  { %v215_v57 = vsel %vm76_vm0, %v171_v53, 0.0  ;;  %v269_v53 = vmul.f32 %v1977_v6, %v1957_v1 }
  0x21   :  { %195 = vadd.xlane.f32.xlu1 %v194_v55  ;;  %99 = vadd.xlane.f32.xlu0 %v98_v56  ;;  %v74_v55 = vmul.f32 %v2090_v32, %v2090_v32  ;;  %v2239_v56 = vld [vmem:[%s2726_s1 + $0x78] sm:$0xff] }
  0x22   :  { %v172_v60 = vmul.f32 %v2239_v56, %v2239_v56 }
  0x23   :  { %v119_v58 = vsel %vm76_vm0, %v74_v55, 0.0 }
  0x24   :  { %v218_v62 = vsel %vm76_vm0, %v172_v60, 0.0 }
  0x25   :  { %198 = vadd.xlane.f32.xlu1 %v197_v63  ;;  %102 = vadd.xlane.f32.xlu0 %v101_v3  ;;  %v122_v63 = vsel %vm76_vm0, %v75_v61, 0.0 }
  0x29   :  { %201 = vadd.xlane.f32.xlu1 %v200_v17  ;;  %105 = vadd.xlane.f32.xlu0 %v104_v18 }
  0x2d   :  { %204 = vadd.xlane.f32.xlu1 %v203_v29  ;;  %108 = vadd.xlane.f32.xlu0 %v107_v30 }
  0x31   :  { %207 = vadd.xlane.f32.xlu1 %v206_v38  ;;  %111 = vadd.xlane.f32.xlu0 %v110_v40 }
  0x35   :  { %210 = vadd.xlane.f32.xlu1 %v209_v45  ;;  %114 = vadd.xlane.f32.xlu0 %v113_v46  ;;  %v270_v45 = vmul.f32 %v1962_v2, %v1952_v0  ;;  %v271_v0 = vmul.f32 %v1989_v9, %v1982_v7 }
  0x39   :  { %213 = vadd.xlane.f32.xlu1 %v212_v51  ;;  %117 = vadd.xlane.f32.xlu0 %v116_v52 }
  0x3d   :  { %216 = vadd.xlane.f32.xlu1 %v215_v57  ;;  %120 = vadd.xlane.f32.xlu0 %v119_v58 }
  0x41   :  { %219 = vadd.xlane.f32.xlu1 %v218_v62  ;;  %123 = vadd.xlane.f32.xlu0 %v122_v63 }
  0x92   :  { %v82_v3 = vpop.xlane.xlu1 %81  ;;  %v79_v4 = vpop.xlane.xlu0 %78 }
  0x93   :  { %v126_v5 = vadd.f32 1e-12, %v82_v3  ;;  %v125_v11 = vadd.f32 1e-12, %v79_v4 }
  0x95   :  { %1759 = vrsqrt.f32 %v126_v5 }
  0x96   :  { %v178_v12 = vpop.xlane.xlu1 %177  ;;  %v175_v16 = vpop.xlane.xlu0 %174  ;;  %1761 = vrsqrt.f32 %v125_v11 }
  0x97   :  { %v222_v17 = vadd.f32 1e-12, %v178_v12  ;;  %v221_v18 = vadd.f32 1e-12, %v175_v16  ;;  %v272_v16 = vmul.f32 %v2042_v22, %v1996_v10 }
  0x99   :  { %1763 = vrsqrt.f32 %v222_v17 }
  0x9a   :  { %1765 = vrsqrt.f32 %v221_v18  ;;  %v181_v19 = vpop.xlane.xlu1 %180  ;;  %v85_v27 = vpop.xlane.xlu0 %84 }
  0x9b   :  { %v223_v29 = vadd.f32 1e-12, %v181_v19  ;;  %v127_v30 = vadd.f32 1e-12, %v85_v27 }
  0x9d   :  { %1767 = vrsqrt.f32 %v223_v29 }
  0x9e   :  { %1769 = vrsqrt.f32 %v127_v30  ;;  %v184_v35 = vpop.xlane.xlu1 %183  ;;  %v88_v36 = vpop.xlane.xlu0 %87 }
  0x9f   :  { %v224_v38 = vadd.f32 1e-12, %v184_v35  ;;  %v128_v40 = vadd.f32 1e-12, %v88_v36  ;;  %v1760_v41 = vpop.eup %1759  ;;  %v273_v35 = vmul.f32 %v2095_v33, %v2005_v13 }
  0xa0   :  { %v1762_v42 = vpop.eup %1761 }
  0xa1   :  { %1771 = vrsqrt.f32 %v224_v38 }
  0xa2   :  { %1773 = vrsqrt.f32 %v128_v40  ;;  %v187_v46 = vpop.xlane.xlu1 %186  ;;  %v91_v47 = vpop.xlane.xlu0 %90 }
  0xa3   :  { %v1764_v48 = vpop.eup %1763  ;;  %v225_v51 = vadd.f32 1e-12, %v187_v46  ;;  %v129_v52 = vadd.f32 1e-12, %v91_v47  ;;  %v274_v46 = vmul.f32 %v2117_v39, %v2010_v14 }
  0xa4   :  { %v1766_v55 = vpop.eup %1765  ;;  %v254_v57 = vmul.f32 %v1764_v48, %v1760_v41 }
  0xa5   :  { %1775 = vrsqrt.f32 %v225_v51  ;;  %v253_v58 = vmul.f32 %v1766_v55, %v1762_v42 }
  0xa6   :  { %1777 = vrsqrt.f32 %v129_v52  ;;  %v190_v60 = vpop.xlane.xlu1 %189  ;;  %v94_v61 = vpop.xlane.xlu0 %93  ;;  %v286_v62 = vmul.f32 %v270_v45, %v254_v57  ;;  %v275_v57 = vmul.f32 %v2128_v44, %v2019_v15 }
  0xa7   :  { %v1768_v63 = vpop.eup %1767  ;;  %v226_v2 = vadd.f32 1e-12, %v190_v60  ;;  %v130_v3 = vadd.f32 1e-12, %v94_v61  ;;  %v285_v4 = vmul.f32 %v269_v53, %v253_v58 }
  0xa8   :  { %v1770_v5 = vpop.eup %1769 }
  0xa9   :  { %1779 = vrsqrt.f32 %v226_v2  ;;  %1612 = vmatprep.mubr.msk.f32.mxu0 %vm76_vm0, %v285_v4  ;;  %v255_v1 = vmul.f32 %v1770_v5, %v1768_v63  ;;  %v276_v2 = vmul.f32 %v2139_v49, %v2032_v20 }
  0xaa   :  { %1781 = vrsqrt.f32 %v130_v3  ;;  %1613 = vmatmul.mubr.msk.f32.vlgmr.msra.gmra.mrb[0].mxu0 %vm76_vm0, %v286_v62  ;;  %v193_v6 = vpop.xlane.xlu1 %192  ;;  %v97_v11 = vpop.xlane.xlu0 %96 }
  0xab   :  { %v1772_v12 = vpop.eup %1771  ;;  %v227_v17 = vadd.f32 1e-12, %v193_v6  ;;  %v131_v18 = vadd.f32 1e-12, %v97_v11  ;;  %v287_v7 = vmul.f32 %v271_v0, %v255_v1 }
  0xac   :  { %v1774_v9 = vpop.eup %1773 }
  0xad   :  { %1783 = vrsqrt.f32 %v227_v17  ;;  %1615 = vmatprep.mubr.msk.f32.mxu0 %vm76_vm0, %v287_v7  ;;  %v256_v19 = vmul.f32 %v1774_v9, %v1772_v12  ;;  %v277_v12 = vmul.f32 %v2150_v54, %v2037_v21 }
  0xae   :  { %1785 = vrsqrt.f32 %v131_v18  ;;  %v196_v27 = vpop.xlane.xlu1 %195  ;;  %v100_v29 = vpop.xlane.xlu0 %99 }
  0xaf   :  { %v1776_v30 = vpop.eup %1775  ;;  %v228_v36 = vadd.f32 1e-12, %v196_v27  ;;  %v132_v38 = vadd.f32 1e-12, %v100_v29  ;;  %v288_v40 = vmul.f32 %v272_v16, %v256_v19  ;;  %v278_v27 = vmul.f32 %v2161_v59, %v2051_v23 }
  0xb0   :  { %v1778_v41 = vpop.eup %1777 }
  0xb1   :  { %1787 = vrsqrt.f32 %v228_v36  ;;  %1616 = vmatmul.mubr.msk.f32.gmra.mrb[2].mxu0 %vm76_vm0, %v288_v40  ;;  %v257_v10 = vmul.f32 %v1778_v41, %v1776_v30  ;;  %v279_v41 = vmul.f32 %v2178_v8, %v2058_v24 }
  0xb2   :  { %1789 = vrsqrt.f32 %v132_v38  ;;  %v199_v22 = vpop.xlane.xlu1 %198  ;;  %v103_v42 = vpop.xlane.xlu0 %102 }
  0xb3   :  { %v1780_v45 = vpop.eup %1779  ;;  %v229_v47 = vadd.f32 1e-12, %v199_v22  ;;  %v133_v48 = vadd.f32 1e-12, %v103_v42  ;;  %v289_v51 = vmul.f32 %v273_v35, %v257_v10 }
  0xb4   :  { %v1782_v52 = vpop.eup %1781 }
  0xb5   :  { %1791 = vrsqrt.f32 %v229_v47  ;;  %1618 = vmatprep.mubr.msk.f32.mxu0 %vm76_vm0, %v289_v51  ;;  %v258_v13 = vmul.f32 %v1782_v52, %v1780_v45 }
  0xb6   :  { %1793 = vrsqrt.f32 %v133_v48  ;;  %v202_v33 = vpop.xlane.xlu1 %201  ;;  %v106_v53 = vpop.xlane.xlu0 %105  ;;  %v280_v48 = vmul.f32 %v2195_v28, %v2063_v25 }
  0xb7   :  { %v1784_v55 = vpop.eup %1783  ;;  %v230_v58 = vadd.f32 1e-12, %v202_v33  ;;  %v134_v60 = vadd.f32 1e-12, %v106_v53  ;;  %v290_v61 = vmul.f32 %v274_v46, %v258_v13 }
  0xb8   :  { %v1786_v62 = vpop.eup %1785 }
  0xb9   :  { %1795 = vrsqrt.f32 %v230_v58  ;;  %1619 = vmatmul.mubr.msk.f32.gmra.mrb[4].mxu0 %vm76_vm0, %v290_v61  ;;  %v259_v14 = vmul.f32 %v1786_v62, %v1784_v55 }
  0xba   :  { %1797 = vrsqrt.f32 %v134_v60  ;;  %v205_v39 = vpop.xlane.xlu1 %204  ;;  %v109_v63 = vpop.xlane.xlu0 %108 }
  0xbb   :  { %v1788_v0 = vpop.eup %1787  ;;  %v231_v3 = vadd.f32 1e-12, %v205_v39  ;;  %v135_v4 = vadd.f32 1e-12, %v109_v63  ;;  %v291_v5 = vmul.f32 %v275_v57, %v259_v14  ;;  %v281_v57 = vmul.f32 %v2206_v37, %v2072_v26 }
  0xbc   :  { %v1790_v1 = vpop.eup %1789  ;;  %v282_v14 = vmul.f32 %v2217_v43, %v2085_v31  ;;  %v283_v26 = vmul.f32 %v2228_v50, %v2090_v32 }
  0xbd   :  { %1799 = vrsqrt.f32 %v231_v3  ;;  %1621 = vmatprep.mubr.msk.f32.mxu0 %vm76_vm0, %v291_v5  ;;  %v260_v15 = vmul.f32 %v1790_v1, %v1788_v0  ;;  %v284_v1 = vmul.f32 %v2239_v56, %v2104_v34 }
  0xbe   :  { %1801 = vrsqrt.f32 %v135_v4  ;;  %v208_v44 = vpop.xlane.xlu1 %207  ;;  %v112_v6 = vpop.xlane.xlu0 %111 }
  0xbf   :  { %v1792_v11 = vpop.eup %1791  ;;  %v232_v16 = vadd.f32 1e-12, %v208_v44  ;;  %v136_v17 = vadd.f32 1e-12, %v112_v6  ;;  %v292_v18 = vmul.f32 %v276_v2, %v260_v15 }
  0xc0   :  { %v1794_v7 = vpop.eup %1793 }
  0xc1   :  { %1803 = vrsqrt.f32 %v232_v16  ;;  %1622 = vmatmul.mubr.msk.f32.gmra.mrb[6].mxu0 %vm76_vm0, %v292_v18  ;;  %v261_v20 = vmul.f32 %v1794_v7, %v1792_v11 }
  0xc2   :  { %1805 = vrsqrt.f32 %v136_v17  ;;  %v211_v49 = vpop.xlane.xlu1 %210  ;;  %v115_v9 = vpop.xlane.xlu0 %114 }
  0xc3   :  { %v1796_v19 = vpop.eup %1795  ;;  %v233_v29 = vadd.f32 1e-12, %v211_v49  ;;  %v137_v30 = vadd.f32 1e-12, %v115_v9  ;;  %v293_v35 = vmul.f32 %v277_v12, %v261_v20 }
  0xc4   :  { %v1798_v36 = vpop.eup %1797 }
  0xc5   :  { %1807 = vrsqrt.f32 %v233_v29  ;;  %1624 = vmatprep.mubr.msk.f32.mxu0 %vm76_vm0, %v293_v35  ;;  %v262_v21 = vmul.f32 %v1798_v36, %v1796_v19 }
  0xc6   :  { %1809 = vrsqrt.f32 %v137_v30  ;;  %v214_v54 = vpop.xlane.xlu1 %213  ;;  %v118_v38 = vpop.xlane.xlu0 %117 }
  0xc7   :  { %v1800_v40 = vpop.eup %1799  ;;  %v234_v10 = vadd.f32 1e-12, %v214_v54  ;;  %v138_v22 = vadd.f32 1e-12, %v118_v38  ;;  %v294_v42 = vmul.f32 %v278_v27, %v262_v21 }
  0xc8   :  { %v1802_v45 = vpop.eup %1801 }
  0xc9   :  { %1811 = vrsqrt.f32 %v234_v10  ;;  %1625 = vmatmul.mubr.msk.f32.gmra.mrb[8].mxu0 %vm76_vm0, %v294_v42  ;;  %v263_v23 = vmul.f32 %v1802_v45, %v1800_v40 }
  0xca   :  { %1813 = vrsqrt.f32 %v138_v22  ;;  %v217_v59 = vpop.xlane.xlu1 %216  ;;  %v121_v46 = vpop.xlane.xlu0 %120 }
  0xcb   :  { %v1804_v47 = vpop.eup %1803  ;;  %v235_v51 = vadd.f32 1e-12, %v217_v59  ;;  %v139_v52 = vadd.f32 1e-12, %v121_v46  ;;  %v295_v13 = vmul.f32 %v279_v41, %v263_v23 }
  0xcc   :  { %v1806_v33 = vpop.eup %1805 }
  0xcd   :  { %1815 = vrsqrt.f32 %v235_v51  ;;  %1627 = vmatprep.mubr.msk.f32.mxu0 %vm76_vm0, %v295_v13  ;;  %v264_v24 = vmul.f32 %v1806_v33, %v1804_v47 }
  0xce   :  { %1817 = vrsqrt.f32 %v139_v52  ;;  %v220_v8 = vpop.xlane.xlu1 %219  ;;  %v124_v53 = vpop.xlane.xlu0 %123 }
  0xcf   :  { %v1808_v55 = vpop.eup %1807  ;;  %v236_v58 = vadd.f32 1e-12, %v220_v8  ;;  %v140_v60 = vadd.f32 1e-12, %v124_v53  ;;  %v296_v61 = vmul.f32 %v280_v48, %v264_v24 }
  0xd0   :  { %v1810_v62 = vpop.eup %1809 }
  0xd1   :  { %1819 = vrsqrt.f32 %v236_v58  ;;  %1628 = vmatmul.mubr.msk.f32.gmra.mrb[10].mxu0 %vm76_vm0, %v296_v61  ;;  %v265_v25 = vmul.f32 %v1810_v62, %v1808_v55 }
  0xd2   :  { %1821 = vrsqrt.f32 %v140_v60 }
  0xd3   :  { %v1812_v28 = vpop.eup %1811  ;;  %v297_v39 = vmul.f32 %v281_v57, %v265_v25 }
  0xd4   :  { %v1814_v63 = vpop.eup %1813 }
  0xd5   :  { %1630 = vmatprep.mubr.msk.f32.mxu0 %vm76_vm0, %v297_v39  ;;  %v266_v0 = vmul.f32 %v1814_v63, %v1812_v28 }
  0xd7   :  { %v1816_v2 = vpop.eup %1815  ;;  %v298_v37 = vmul.f32 %v282_v14, %v266_v0 }
  0xd8   :  { %v1818_v3 = vpop.eup %1817 }
  0xd9   :  { %1631 = vmatmul.mubr.msk.f32.gmra.mrb[12].mxu0 %vm76_vm0, %v298_v37  ;;  %v267_v4 = vmul.f32 %v1818_v3, %v1816_v2 }
  0xdb   :  { %v1820_v5 = vpop.eup %1819  ;;  %v299_v15 = vmul.f32 %v283_v26, %v267_v4 }
  0xdc   :  { %v1822_v31 = vpop.eup %1821 }
  0xdd   :  { %1633 = vmatprep.mubr.msk.f32.mxu0 %vm76_vm0, %v299_v15  ;;  %v268_v43 = vmul.f32 %v1822_v31, %v1820_v5 }
  0xdf   :  { %v300_v44 = vmul.f32 %v284_v1, %v268_v43 }
  0xe1   :  { %1634 = vmatmul.mubr.msk.f32.gmra.mrb[14].mxu0 %vm76_vm0, %v300_v44 }
 0x17d   :  { %v1614_v6 = vpop.f32.mrb[0].mxu0 }
 0x17e   :  { %v419_v32 = vpop.f32.mrb[1].mxu0  ;;  %v502_v50 = vsel %vm498_vm1, %v1614_v6, -inf }
 0x17f   :  { %503 = vmax.xlane.f32.xlu1 %v502_v50  ;;  %v499_v11 = vsel %vm498_vm1, %v419_v32, -inf }
 0x180   :  { %500 = vmax.xlane.f32.xlu0 %v499_v11 }
 0x184   :  { %v1617_v12 = vpop.f32.mrb[2].mxu0 }
 0x185   :  { %v429_v16 = vpop.f32.mrb[3].mxu0  ;;  %v508_v34 = vsel %vm498_vm1, %v1617_v12, -inf }
 0x186   :  { %509 = vmax.xlane.f32.xlu1 %v508_v34  ;;  %v505_v56 = vsel %vm498_vm1, %v429_v16, -inf }
 0x187   :  { %506 = vmax.xlane.f32.xlu0 %v505_v56 }
 0x18c   :  { %v1620_v17 = vpop.f32.mrb[4].mxu0 }
 0x18d   :  { %v439_v18 = vpop.f32.mrb[5].mxu0  ;;  %v514_v7 = vsel %vm498_vm1, %v1620_v17, -inf }
 0x18e   :  { %515 = vmax.xlane.f32.xlu1 %v514_v7  ;;  %v511_v20 = vsel %vm498_vm1, %v439_v18, -inf }
 0x18f   :  { %512 = vmax.xlane.f32.xlu0 %v511_v20 }
 0x194   :  { %v2303_v49 = vpop.f32.mrb[6].mxu0 }
 0x195   :  { %v2305_v9 = vpop.f32.mrb[7].mxu0  ;;  %v520_v19 = vsel %vm498_vm1, %v2303_v49, -inf }
 0x196   :  { %521 = vmax.xlane.f32.xlu1 %v520_v19  ;;  %v517_v27 = vsel %vm498_vm1, %v2305_v9, -inf }
 0x197   :  { %518 = vmax.xlane.f32.xlu0 %v517_v27 }
 0x19c   :  { %v2311_v29 = vpop.f32.mrb[8].mxu0 }
 0x19d   :  { %v2313_v30 = vpop.f32.mrb[9].mxu0  ;;  %v526_v35 = vsel %vm498_vm1, %v2311_v29, -inf }
 0x19e   :  { %527 = vmax.xlane.f32.xlu1 %v526_v35  ;;  %v523_v36 = vsel %vm498_vm1, %v2313_v30, -inf }
 0x19f   :  { %524 = vmax.xlane.f32.xlu0 %v523_v36 }
 0x1a4   :  { %v2319_v21 = vpop.f32.mrb[10].mxu0 }
 0x1a5   :  { %v2321_v54 = vpop.f32.mrb[11].mxu0  ;;  %v532_v38 = vsel %vm498_vm1, %v2319_v21, -inf }
 0x1a6   :  { %533 = vmax.xlane.f32.xlu1 %v532_v38  ;;  %v529_v40 = vsel %vm498_vm1, %v2321_v54, -inf }
 0x1a7   :  { %530 = vmax.xlane.f32.xlu0 %v529_v40 }
 0x1ac   :  { %v2327_v41 = vpop.f32.mrb[12].mxu0 }
 0x1ad   :  { %v2329_v10 = vpop.f32.mrb[13].mxu0  ;;  %v538_v22 = vsel %vm498_vm1, %v2327_v41, -inf }
 0x1ae   :  { %539 = vmax.xlane.f32.xlu1 %v538_v22  ;;  %v535_v42 = vsel %vm498_vm1, %v2329_v10, -inf }
 0x1af   :  { %536 = vmax.xlane.f32.xlu0 %v535_v42 }
 0x1b4   :  { %v2335_v45 = vpop.f32.mrb[14].mxu0 }
 0x1b5   :  { %v2337_v23 = vpop.f32.mrb[15].mxu0  ;;  %v544_v59 = vsel %vm498_vm1, %v2335_v45, -inf }
 0x1b6   :  { %545 = vmax.xlane.f32.xlu1 %v544_v59  ;;  %v541_v46 = vsel %vm498_vm1, %v2337_v23, -inf }
 0x1b7   :  { %542 = vmax.xlane.f32.xlu0 %v541_v46 }
 0x20c   :  { %v504_v47 = vpop.xlane.xlu1 %503 }
 0x20d   :  { %v548_v48 = vsub.f32 %v1614_v6, %v504_v47  ;;  %v501_v51 = vpop.xlane.xlu0 %500 }
 0x20e   :  { %v547_v52 = vsub.f32 %v419_v32, %v501_v51 }
 0x20f   :  { %v565_v13 = vmul.f32 1.442695, %v548_v48 }
 0x210   :  { %v563_v33 = vmul.f32 1.442695, %v547_v52 }
 0x211   :  { %1823 = vpow2.f32 %v565_v13 }
 0x212   :  { %1825 = vpow2.f32 %v563_v33 }
 0x213   :  { %v510_v24 = vpop.xlane.xlu1 %509 }
 0x214   :  { %v550_v8 = vsub.f32 %v1617_v12, %v510_v24  ;;  %v507_v53 = vpop.xlane.xlu0 %506 }
 0x215   :  { %v549_v55 = vsub.f32 %v429_v16, %v507_v53 }
 0x216   :  { %v569_v57 = vmul.f32 1.442695, %v550_v8 }
 0x217   :  { %v567_v58 = vmul.f32 1.442695, %v549_v55 }
 0x218   :  { %1827 = vpow2.f32 %v569_v57 }
 0x219   :  { %1829 = vpow2.f32 %v567_v58 }
 0x21b   :  { %v2343_v60 = vpop.eup %1823  ;;  %v516_v61 = vpop.xlane.xlu1 %515 }
 0x21c   :  { %v2345_v62 = vpop.eup %1825  ;;  %v552_v25 = vsub.f32 %v1620_v17, %v516_v61  ;;  %v513_v28 = vpop.xlane.xlu0 %512  ;;  %v598_v14 = vsel %vm498_vm1, %v2343_v60, 0.0 }
 0x21d   :  { %v551_v39 = vsub.f32 %v439_v18, %v513_v28  ;;  %599 = vadd.xlane.f32.xlu1 %v598_v14  ;;  %v595_v63 = vsel %vm498_vm1, %v2345_v62, 0.0 }
 0x21e   :  { %v573_v0 = vmul.f32 1.442695, %v552_v25  ;;  %596 = vadd.xlane.f32.xlu0 %v595_v63 }
 0x21f   :  { %v571_v2 = vmul.f32 1.442695, %v551_v39 }
 0x220   :  { %1831 = vpow2.f32 %v573_v0 }
 0x221   :  { %1833 = vpow2.f32 %v571_v2 }
 0x222   :  { %v2351_v26 = vpop.eup %1827 }
 0x223   :  { %v2353_v37 = vpop.eup %1829  ;;  %v522_v3 = vpop.xlane.xlu1 %521  ;;  %v604_v4 = vsel %vm498_vm1, %v2351_v26, 0.0 }
 0x224   :  { %v554_v5 = vsub.f32 %v2303_v49, %v522_v3  ;;  %605 = vadd.xlane.f32.xlu1 %v604_v4  ;;  %v519_v1 = vpop.xlane.xlu0 %518  ;;  %v601_v15 = vsel %vm498_vm1, %v2353_v37, 0.0 }
 0x225   :  { %v553_v31 = vsub.f32 %v2305_v9, %v519_v1  ;;  %602 = vadd.xlane.f32.xlu0 %v601_v15 }
 0x226   :  { %v577_v43 = vmul.f32 1.442695, %v554_v5 }
 0x227   :  { %v575_v44 = vmul.f32 1.442695, %v553_v31 }
 0x228   :  { %1835 = vpow2.f32 %v577_v43 }
 0x229   :  { %1837 = vpow2.f32 %v575_v44 }
 0x22a   :  { %v2361_v6 = vpop.eup %1831 }
 0x22b   :  { %v2363_v32 = vpop.eup %1833  ;;  %v528_v50 = vpop.xlane.xlu1 %527  ;;  %v610_v11 = vsel %vm498_vm1, %v2361_v6, 0.0 }
 0x22c   :  { %v556_v12 = vsub.f32 %v2311_v29, %v528_v50  ;;  %611 = vadd.xlane.f32.xlu1 %v610_v11  ;;  %v525_v16 = vpop.xlane.xlu0 %524  ;;  %v607_v34 = vsel %vm498_vm1, %v2363_v32, 0.0 }
 0x22d   :  { %v555_v56 = vsub.f32 %v2313_v30, %v525_v16  ;;  %608 = vadd.xlane.f32.xlu0 %v607_v34  ;;  %v675_v30 = vld [vmem:[%s2728_s3] sm:$0xff] }
 0x22e   :  { %v581_v17 = vmul.f32 1.442695, %v556_v12  ;;  %1636 = vmatprep.subr.mxu1 %v675_v30 }
 0x22f   :  { %v579_v18 = vmul.f32 1.442695, %v555_v56  ;;  %1637 = vmatpush3.msra.mxu1 %v675_v30 }
 0x230   :  { %1839 = vpow2.f32 %v581_v17 }
 0x231   :  { %1841 = vpow2.f32 %v579_v18 }
 0x232   :  { %v2371_v7 = vpop.eup %1835 }
 0x233   :  { %v2373_v20 = vpop.eup %1837  ;;  %v534_v49 = vpop.xlane.xlu1 %533  ;;  %v616_v9 = vsel %vm498_vm1, %v2371_v7, 0.0 }
 0x234   :  { %v558_v19 = vsub.f32 %v2319_v21, %v534_v49  ;;  %617 = vadd.xlane.f32.xlu1 %v616_v9  ;;  %v531_v27 = vpop.xlane.xlu0 %530  ;;  %v613_v29 = vsel %vm498_vm1, %v2373_v20, 0.0 }
 0x235   :  { %v557_v35 = vsub.f32 %v2321_v54, %v531_v27  ;;  %614 = vadd.xlane.f32.xlu0 %v613_v29 }
 0x236   :  { %v585_v36 = vmul.f32 1.442695, %v558_v19 }
 0x237   :  { %v583_v38 = vmul.f32 1.442695, %v557_v35 }
 0x238   :  { %1843 = vpow2.f32 %v585_v36 }
 0x239   :  { %1845 = vpow2.f32 %v583_v38 }
 0x23a   :  { %v2384_v40 = vpop.eup %1839 }
 0x23b   :  { %v2386_v21 = vpop.eup %1841  ;;  %v540_v22 = vpop.xlane.xlu1 %539  ;;  %v622_v42 = vsel %vm498_vm1, %v2384_v40, 0.0 }
 0x23c   :  { %v560_v59 = vsub.f32 %v2327_v41, %v540_v22  ;;  %623 = vadd.xlane.f32.xlu1 %v622_v42  ;;  %v537_v46 = vpop.xlane.xlu0 %536  ;;  %v619_v54 = vsel %vm498_vm1, %v2386_v21, 0.0 }
 0x23d   :  { %v559_v47 = vsub.f32 %v2329_v10, %v537_v46  ;;  %620 = vadd.xlane.f32.xlu0 %v619_v54 }
 0x23e   :  { %v589_v48 = vmul.f32 1.442695, %v560_v59 }
 0x23f   :  { %v587_v51 = vmul.f32 1.442695, %v559_v47 }
 0x240   :  { %1847 = vpow2.f32 %v589_v48 }
 0x241   :  { %1849 = vpow2.f32 %v587_v51 }
 0x242   :  { %v2394_v52 = vpop.eup %1843 }
 0x243   :  { %v2396_v13 = vpop.eup %1845  ;;  %v546_v33 = vpop.xlane.xlu1 %545  ;;  %v628_v41 = vsel %vm498_vm1, %v2394_v52, 0.0 }
 0x244   :  { %v562_v24 = vsub.f32 %v2335_v45, %v546_v33  ;;  %629 = vadd.xlane.f32.xlu1 %v628_v41  ;;  %v543_v8 = vpop.xlane.xlu0 %542  ;;  %v625_v10 = vsel %vm498_vm1, %v2396_v13, 0.0  ;;  %v998_v33 = vld [vmem:[%s2729_s4] sm:$0xff]  ;;  %v999_v41 = vld [vmem:[%s2729_s4 + $0x8] sm:$0xff] }
 0x245   :  { %v561_v53 = vsub.f32 %v2337_v23, %v543_v8  ;;  %626 = vadd.xlane.f32.xlu0 %v625_v10  ;;  %v1738_v8 = vpack.c.bf16 %v999_v41, %v998_v33  ;;  %v1001_v10 = vld [vmem:[%s2729_s4 + $0x18] sm:$0xff] }
 0x246   :  { %v593_v55 = vmul.f32 1.442695, %v562_v24  ;;  %v1000_v24 = vld [vmem:[%s2729_s4 + $0x10] sm:$0xff] }
 0x247   :  { %v591_v57 = vmul.f32 1.442695, %v561_v53  ;;  %v1742_v53 = vpack.c.bf16 %v1001_v10, %v1000_v24  ;;  %1739 = vmatprep.subr.bf16.mxu1 %v1738_v8 }
 0x248   :  { %1851 = vpow2.f32 %v593_v55  ;;  %v1002_v55 = vld [vmem:[%s2729_s4 + $0x20] sm:$0xff] }
 0x249   :  { %1853 = vpow2.f32 %v591_v57  ;;  %v1003_v57 = vld [vmem:[%s2729_s4 + $0x28] sm:$0xff] }
 0x24a   :  { %v2404_v58 = vpop.eup %1847 }
 0x24b   :  { %v2406_v61 = vpop.eup %1849  ;;  %v634_v25 = vsel %vm498_vm1, %v2404_v58, 0.0 }
 0x24c   :  { %635 = vadd.xlane.f32.xlu1 %v634_v25  ;;  %v631_v45 = vsel %vm498_vm1, %v2406_v61, 0.0  ;;  %v1005_v25 = vld [vmem:[%s2729_s4 + $0x38] sm:$0xff] }
 0x24d   :  { %632 = vadd.xlane.f32.xlu0 %v631_v45 }
 0x252   :  { %v2412_v28 = vpop.eup %1851 }
 0x253   :  { %v2414_v23 = vpop.eup %1853  ;;  %v640_v14 = vsel %vm498_vm1, %v2412_v28, 0.0 }
 0x254   :  { %641 = vadd.xlane.f32.xlu1 %v640_v14  ;;  %v637_v39 = vsel %vm498_vm1, %v2414_v23, 0.0 }
 0x255   :  { %638 = vadd.xlane.f32.xlu0 %v637_v39 }
 0x2aa   :  { %v600_v63 = vpop.xlane.xlu1 %599 }
 0x2ab   :  { %1855 = vrcp.f32 %v600_v63  ;;  %v597_v0 = vpop.xlane.xlu0 %596  ;;  %v1888_v63 = vld [vmem:[%s2726_s1] sm:$0xff] }
 0x2ac   :  { %1857 = vrcp.f32 %v597_v0 }
 0x2b1   :  { %v606_v2 = vpop.xlane.xlu1 %605 }
 0x2b2   :  { %1859 = vrcp.f32 %v606_v2  ;;  %v603_v3 = vpop.xlane.xlu0 %602 }
 0x2b3   :  { %1861 = vrcp.f32 %v603_v3  ;;  %v1889_v3 = vld [vmem:[%s2726_s1 + $0x18] sm:$0xff] }
 0x2b5   :  { %v1856_v4 = vpop.eup %1855 }
 0x2b6   :  { %v1858_v5 = vpop.eup %1857  ;;  %v660_v15 = vmul.f32 %v1856_v4, %v2343_v60 }
 0x2b7   :  { %v659_v1 = vmul.f32 %v1858_v5, %v2345_v62 }
 0x2b9   :  { %v612_v31 = vpop.xlane.xlu1 %611  ;;  %1638 = vmatprep.mubr.msk.f32.mxu1 %vm498_vm1, %v659_v1  ;;  %v1890_v1 = vld [vmem:[%s2726_s1 + $0x10] sm:$0xff] }
 0x2ba   :  { %1863 = vrcp.f32 %v612_v31  ;;  %1639 = vmatmul.mubr.msk.f32.vlgmr.msra.gmra.mrb[0].mxu1 %vm498_vm1, %v660_v15  ;;  %v609_v43 = vpop.xlane.xlu0 %608 }
 0x2bb   :  { %1865 = vrcp.f32 %v609_v43  ;;  %1741 = vmatpush3.bf16.msra.mxu1 %v1738_v8  ;;  %v1891_v43 = vld [vmem:[%s2726_s1 + $0x28] sm:$0xff] }
 0x2bc   :  { %v1860_v44 = vpop.eup %1859  ;;  %1743 = vmatprep.subr.bf16.mxu1 %v1742_v53 }
 0x2bd   :  { %v1862_v50 = vpop.eup %1861  ;;  %v662_v12 = vmul.f32 %v1860_v44, %v2351_v26 }
 0x2be   :  { %v661_v11 = vmul.f32 %v1862_v50, %v2353_v37 }
 0x2bf   :  { %1745 = vmatpush3.bf16.msra.mxu1 %v1742_v53 }
 0x2c0   :  { %1641 = vmatprep.mubr.msk.f32.mxu1 %vm498_vm1, %v661_v11  ;;  %v1892_v11 = vld [vmem:[%s2726_s1 + $0x20] sm:$0xff] }
 0x2c1   :  { %v618_v16 = vpop.xlane.xlu1 %617  ;;  %1642 = vmatmul.mubr.msk.f32.gmra.mrb[2].mxu1 %vm498_vm1, %v662_v12 }
 0x2c2   :  { %1867 = vrcp.f32 %v618_v16  ;;  %v615_v60 = vpop.xlane.xlu0 %614 }
 0x2c3   :  { %1869 = vrcp.f32 %v615_v60  ;;  %v1893_v60 = vld [vmem:[%s2726_s1 + $0x38] sm:$0xff] }
 0x2c4   :  { %v1864_v62 = vpop.eup %1863 }
 0x2c5   :  { %v1866_v34 = vpop.eup %1865  ;;  %v664_v17 = vmul.f32 %v1864_v62, %v2361_v6 }
 0x2c6   :  { %v663_v56 = vmul.f32 %v1866_v34, %v2363_v32 }
 0x2c8   :  { %1644 = vmatprep.mubr.msk.f32.mxu1 %vm498_vm1, %v663_v56  ;;  %v1894_v56 = vld [vmem:[%s2726_s1 + $0x30] sm:$0xff] }
 0x2c9   :  { %v624_v18 = vpop.xlane.xlu1 %623  ;;  %1645 = vmatmul.mubr.msk.f32.gmra.mrb[4].mxu1 %vm498_vm1, %v664_v17 }
 0x2ca   :  { %1871 = vrcp.f32 %v624_v18  ;;  %v621_v26 = vpop.xlane.xlu0 %620 }
 0x2cb   :  { %1873 = vrcp.f32 %v621_v26  ;;  %v1895_v26 = vld [vmem:[%s2726_s1 + $0x48] sm:$0xff] }
 0x2cc   :  { %v1868_v37 = vpop.eup %1867 }
 0x2cd   :  { %v1870_v49 = vpop.eup %1869  ;;  %v666_v19 = vmul.f32 %v1868_v37, %v2371_v7 }
 0x2ce   :  { %v665_v9 = vmul.f32 %v1870_v49, %v2373_v20 }
 0x2d0   :  { %1647 = vmatprep.mubr.msk.f32.mxu1 %vm498_vm1, %v665_v9  ;;  %v1896_v9 = vld [vmem:[%s2726_s1 + $0x40] sm:$0xff] }
 0x2d1   :  { %v630_v27 = vpop.xlane.xlu1 %629  ;;  %1648 = vmatmul.mubr.msk.f32.gmra.mrb[6].mxu1 %vm498_vm1, %v666_v19 }
 0x2d2   :  { %1875 = vrcp.f32 %v630_v27  ;;  %v627_v6 = vpop.xlane.xlu0 %626 }
 0x2d3   :  { %1877 = vrcp.f32 %v627_v6  ;;  %v1897_v6 = vld [vmem:[%s2726_s1 + $0x58] sm:$0xff] }
 0x2d4   :  { %v1872_v32 = vpop.eup %1871 }
 0x2d5   :  { %v1874_v29 = vpop.eup %1873  ;;  %v668_v35 = vmul.f32 %v1872_v32, %v2384_v40 }
 0x2d6   :  { %v667_v30 = vmul.f32 %v1874_v29, %v2386_v21 }
 0x2d8   :  { %1650 = vmatprep.mubr.msk.f32.mxu1 %vm498_vm1, %v667_v30  ;;  %v1898_v30 = vld [vmem:[%s2726_s1 + $0x50] sm:$0xff] }
 0x2d9   :  { %v636_v36 = vpop.xlane.xlu1 %635  ;;  %1651 = vmatmul.mubr.msk.f32.gmra.mrb[8].mxu1 %vm498_vm1, %v668_v35 }
 0x2da   :  { %1879 = vrcp.f32 %v636_v36  ;;  %v633_v7 = vpop.xlane.xlu0 %632 }
 0x2db   :  { %1881 = vrcp.f32 %v633_v7  ;;  %v1899_v7 = vld [vmem:[%s2726_s1 + $0x68] sm:$0xff] }
 0x2dc   :  { %v1876_v20 = vpop.eup %1875 }
 0x2dd   :  { %v1878_v38 = vpop.eup %1877  ;;  %v670_v42 = vmul.f32 %v1876_v20, %v2394_v52 }
 0x2de   :  { %v669_v22 = vmul.f32 %v1878_v38, %v2396_v13 }
 0x2e0   :  { %1653 = vmatprep.mubr.msk.f32.mxu1 %vm498_vm1, %v669_v22  ;;  %v1900_v22 = vld [vmem:[%s2726_s1 + $0x60] sm:$0xff] }
 0x2e1   :  { %v642_v59 = vpop.xlane.xlu1 %641  ;;  %1654 = vmatmul.mubr.msk.f32.gmra.mrb[10].mxu1 %vm498_vm1, %v670_v42 }
 0x2e2   :  { %1883 = vrcp.f32 %v642_v59  ;;  %v639_v40 = vpop.xlane.xlu0 %638 }
 0x2e3   :  { %1885 = vrcp.f32 %v639_v40  ;;  %v1901_v40 = vld [vmem:[%s2726_s1 + $0x78] sm:$0xff] }
 0x2e4   :  { %v1880_v21 = vpop.eup %1879 }
 0x2e5   :  { %v1882_v46 = vpop.eup %1881  ;;  %v672_v47 = vmul.f32 %v1880_v21, %v2404_v58  ;;  %v1746_v58 = vpack.c.bf16 %v1003_v57, %v1002_v55 }
 0x2e6   :  { %v671_v54 = vmul.f32 %v1882_v46, %v2406_v61  ;;  %v1004_v61 = vld [vmem:[%s2729_s4 + $0x30] sm:$0xff] }
 0x2e7   :  { %1747 = vmatprep.subr.bf16.mxu1 %v1746_v58  ;;  %v1750_v45 = vpack.c.bf16 %v1005_v25, %v1004_v61 }
 0x2e8   :  { %1656 = vmatprep.mubr.msk.f32.mxu1 %vm498_vm1, %v671_v54  ;;  %1749 = vmatpush3.bf16.msra.mxu1 %v1746_v58  ;;  %v1902_v54 = vld [vmem:[%s2726_s1 + $0x70] sm:$0xff] }
 0x2e9   :  { %1657 = vmatmul.mubr.msk.f32.gmra.mrb[12].mxu1 %vm498_vm1, %v672_v47  ;;  %1751 = vmatprep.subr.bf16.mxu1 %v1750_v45 }
 0x2ec   :  { %v1884_v48 = vpop.eup %1883  ;;  %1753 = vmatpush3.bf16.msra.mxu1 %v1750_v45 }
 0x2ed   :  { %v1886_v51 = vpop.eup %1885  ;;  %v674_v13 = vmul.f32 %v1884_v48, %v2412_v28 }
 0x2ee   :  { %v673_v52 = vmul.f32 %v1886_v51, %v2414_v23  ;;  %v1887_v23 = vld [vmem:[%s2726_s1 + $0x8] sm:$0xff] }
 0x2f0   :  { %1659 = vmatprep.mubr.msk.f32.mxu1 %vm498_vm1, %v673_v52 }
 0x2f1   :  { %1660 = vmatmul.mubr.msk.f32.gmra.mrb[14].mxu1 %vm498_vm1, %v674_v13 }
 0x38d   :  { %v1640_v28 = vpop.f32.mrb[0].mxu1 }
 0x38e   :  { %v870_v14 = vmul.f32 %v1887_v23, %v1640_v28  ;;  %v790_v39 = vpop.f32.mrb[1].mxu1 }
 0x38f   :  { %v869_v0 = vmul.f32 %v1888_v63, %v790_v39 }
 0x390   :  { %1420 = vst.msk [vmem:[%s2730_s7 + $0x8] sm:$0xff] %vm76_vm0, %v870_v14  ;;  %919 = vrot.lane.b32.xlu1 %v870_v14, %s1903_s28 }
 0x391   :  { %1419 = vst.msk [vmem:[%s2730_s7] sm:$0xff] %vm76_vm0, %v869_v0  ;;  %917 = vrot.lane.b32.xlu0 %v869_v0, %s1903_s28 }
 0x394   :  { %v1643_v2 = vpop.f32.mrb[2].mxu1 }
 0x395   :  { %v872_v4 = vmul.f32 %v1889_v3, %v1643_v2  ;;  %v800_v5 = vpop.f32.mrb[3].mxu1 }
 0x396   :  { %v871_v15 = vmul.f32 %v1890_v1, %v800_v5 }
 0x397   :  { %1422 = vst.msk [vmem:[%s2730_s7 + $0x18] sm:$0xff] %vm76_vm0, %v872_v4 }
 0x398   :  { %1421 = vst.msk [vmem:[%s2730_s7 + $0x10] sm:$0xff] %vm76_vm0, %v871_v15  ;;  %921 = vrot.lane.b32.xlu1 %v871_v15, %s1903_s28 }
 0x39c   :  { %923 = vrot.lane.b32.xlu1 %v872_v4, %s1903_s28  ;;  %v1646_v31 = vpop.f32.mrb[4].mxu1 }
 0x39d   :  { %v874_v44 = vmul.f32 %v1891_v43, %v1646_v31  ;;  %v810_v50 = vpop.f32.mrb[5].mxu1 }
 0x39e   :  { %v873_v12 = vmul.f32 %v1892_v11, %v810_v50  ;;  %v1223_v11 = vld [vmem:[%s2731_s6] sm:$0xff] }
 0x39f   :  { %1424 = vst.msk [vmem:[%s2730_s7 + $0x28] sm:$0xff] %vm76_vm0, %v874_v44 }
 0x3a0   :  { %1423 = vst.msk [vmem:[%s2730_s7 + $0x20] sm:$0xff] %vm76_vm0, %v873_v12  ;;  %927 = vrot.lane.b32.xlu1 %v874_v44, %s1903_s28  ;;  %925 = vrot.lane.b32.xlu0 %v873_v12, %s1903_s28  ;;  %v1224_v12 = vld [vmem:[%s2731_s6 + $0x8] sm:$0xff] }
 0x3a4   :  { %v1649_v16 = vpop.f32.mrb[6].mxu1 }
 0x3a5   :  { %v876_v62 = vmul.f32 %v1893_v60, %v1649_v16  ;;  %v820_v34 = vpop.f32.mrb[7].mxu1  ;;  %v1754_v16 = vpack.c.bf16 %v1224_v12, %v1223_v11  ;;  %v1492_v60 = vld [vmem:[%s2732_s5] ss:$0 sm:$0xff] }
 0x3a6   :  { %v875_v17 = vmul.f32 %v1894_v56, %v820_v34 }
 0x3a7   :  { %1426 = vst.msk [vmem:[%s2730_s7 + $0x38] sm:$0xff] %vm76_vm0, %v876_v62  ;;  %931 = vrot.lane.b32.xlu1 %v876_v62, %s1903_s28  ;;  %1755 = vmatprep.subr.bf16.mxu0 %v1754_v16 }
 0x3a8   :  { %1425 = vst.msk [vmem:[%s2730_s7 + $0x30] sm:$0xff] %vm76_vm0, %v875_v17  ;;  %929 = vrot.lane.b32.xlu0 %v875_v17, %s1903_s28  ;;  %1757 = vmatpush3.bf16.msra.mxu0 %v1754_v16 }
 0x3ac   :  { %v1652_v18 = vpop.f32.mrb[8].mxu1 }
 0x3ad   :  { %v878_v37 = vmul.f32 %v1895_v26, %v1652_v18  ;;  %v830_v49 = vpop.f32.mrb[9].mxu1 }
 0x3ae   :  { %v877_v19 = vmul.f32 %v1896_v9, %v830_v49 }
 0x3af   :  { %1428 = vst.msk [vmem:[%s2730_s7 + $0x48] sm:$0xff] %vm76_vm0, %v878_v37  ;;  %935 = vrot.lane.b32.xlu1 %v878_v37, %s1903_s28 }
 0x3b0   :  { %1427 = vst.msk [vmem:[%s2730_s7 + $0x40] sm:$0xff] %vm76_vm0, %v877_v19  ;;  %933 = vrot.lane.b32.xlu0 %v877_v19, %s1903_s28 }
 0x3b4   :  { %v1655_v27 = vpop.f32.mrb[10].mxu1 }
 0x3b5   :  { %v880_v32 = vmul.f32 %v1897_v6, %v1655_v27  ;;  %v840_v29 = vpop.f32.mrb[11].mxu1 }
 0x3b6   :  { %v879_v35 = vmul.f32 %v1898_v30, %v840_v29 }
 0x3b7   :  { %1430 = vst.msk [vmem:[%s2730_s7 + $0x58] sm:$0xff] %vm76_vm0, %v880_v32  ;;  %939 = vrot.lane.b32.xlu1 %v880_v32, %s1903_s28 }
 0x3b8   :  { %1429 = vst.msk [vmem:[%s2730_s7 + $0x50] sm:$0xff] %vm76_vm0, %v879_v35  ;;  %937 = vrot.lane.b32.xlu0 %v879_v35, %s1903_s28 }
 0x3bc   :  { %v1658_v36 = vpop.f32.mrb[12].mxu1 }
 0x3bd   :  { %v882_v20 = vmul.f32 %v1899_v7, %v1658_v36  ;;  %v850_v38 = vpop.f32.mrb[13].mxu1 }
 0x3be   :  { %v881_v42 = vmul.f32 %v1900_v22, %v850_v38 }
 0x3bf   :  { %1432 = vst.msk [vmem:[%s2730_s7 + $0x68] sm:$0xff] %vm76_vm0, %v882_v20  ;;  %943 = vrot.lane.b32.xlu1 %v882_v20, %s1903_s28 }
 0x3c0   :  { %1431 = vst.msk [vmem:[%s2730_s7 + $0x60] sm:$0xff] %vm76_vm0, %v881_v42  ;;  %941 = vrot.lane.b32.xlu0 %v881_v42, %s1903_s28 }
 0x3c4   :  { %v1661_v59 = vpop.f32.mrb[14].mxu1 }
 0x3c5   :  { %v884_v21 = vmul.f32 %v1901_v40, %v1661_v59  ;;  %v860_v46 = vpop.f32.mrb[15].mxu1 }
 0x3c6   :  { %v883_v47 = vmul.f32 %v1902_v54, %v860_v46 }
 0x3c7   :  { %1434 = vst.msk [vmem:[%s2730_s7 + $0x78] sm:$0xff] %vm76_vm0, %v884_v21  ;;  %947 = vrot.lane.b32.xlu1 %v884_v21, %s1903_s28 }
 0x3c8   :  { %1433 = vst.msk [vmem:[%s2730_s7 + $0x70] sm:$0xff] %vm76_vm0, %v883_v47  ;;  %945 = vrot.lane.b32.xlu0 %v883_v47, %s1903_s28 }
 0x402   :  { %v920_v48 = vpop.permute.xlu1 %919 }
 0x403   :  { %967 = vst.msk [vmem:[#allocation2 + $0x8] sm:$0xff] %vm965_vm2, %v920_v48  ;;  %v918_v51 = vpop.permute.xlu0 %917 }
 0x404   :  { %966 = vst.msk [vmem:[#allocation2] sm:$0xff] %vm965_vm2, %v918_v51 }
 0x40a   :  { %v922_v52 = vpop.permute.xlu1 %921  ;;  %v983_v33 = vld [vmem:[#allocation2 + $0x8] sm:$0xff] }
 0x40b   :  { %968 = vst.msk [vmem:[#allocation2 + $0x10] sm:$0xff] %vm965_vm2, %v922_v52  ;;  %v982_v13 = vld [vmem:[#allocation2] sm:$0xff] }
 0x40c   :  { %1678 = vmatprep.mubr.msk.f32.mxu1 %vm1013_vm3, %v982_v13 }
 0x40d   :  { %1679 = vmatmul.mubr.msk.f32.vlgmr.msra.gmra.mrb[16].mxu1 %vm1013_vm3, %v983_v33 }
 0x40e   :  { %v924_v41 = vpop.permute.xlu1 %923 }
 0x40f   :  { %969 = vst.msk [vmem:[#allocation2 + $0x18] sm:$0xff] %vm965_vm2, %v924_v41 }
 0x412   :  { %v928_v24 = vpop.permute.xlu1 %927  ;;  %v926_v8 = vpop.permute.xlu0 %925  ;;  %v984_v10 = vld [vmem:[#allocation2 + $0x10] sm:$0xff] }
 0x413   :  { %971 = vst.msk [vmem:[#allocation2 + $0x28] sm:$0xff] %vm965_vm2, %v928_v24  ;;  %970 = vst.msk [vmem:[#allocation2 + $0x20] sm:$0xff] %vm965_vm2, %v926_v8  ;;  %1681 = vmatprep.mubr.msk.f32.mxu1 %vm1013_vm3, %v984_v10 }
 0x416   :  { %v985_v53 = vld [vmem:[#allocation2 + $0x18] sm:$0xff] }
 0x417   :  { %1682 = vmatmul.mubr.msk.f32.gmra.mrb[18].mxu1 %vm1013_vm3, %v985_v53 }
 0x419   :  { %v932_v55 = vpop.permute.xlu1 %931 }
 0x41a   :  { %973 = vst.msk [vmem:[#allocation2 + $0x38] sm:$0xff] %vm965_vm2, %v932_v55  ;;  %v930_v57 = vpop.permute.xlu0 %929  ;;  %v986_v58 = vld [vmem:[#allocation2 + $0x20] sm:$0xff]  ;;  %v987_v61 = vld [vmem:[#allocation2 + $0x28] sm:$0xff] }
 0x41b   :  { %972 = vst.msk [vmem:[#allocation2 + $0x30] sm:$0xff] %vm965_vm2, %v930_v57  ;;  %1684 = vmatprep.mubr.msk.f32.mxu1 %vm1013_vm3, %v986_v58 }
 0x41c   :  { %1685 = vmatmul.mubr.msk.f32.gmra.mrb[20].mxu1 %vm1013_vm3, %v987_v61 }
 0x421   :  { %v936_v25 = vpop.permute.xlu1 %935  ;;  %v989_v23 = vld [vmem:[#allocation2 + $0x38] sm:$0xff] }
 0x422   :  { %975 = vst.msk [vmem:[#allocation2 + $0x48] sm:$0xff] %vm965_vm2, %v936_v25  ;;  %v934_v45 = vpop.permute.xlu0 %933  ;;  %v988_v28 = vld [vmem:[#allocation2 + $0x30] sm:$0xff] }
 0x423   :  { %974 = vst.msk [vmem:[#allocation2 + $0x40] sm:$0xff] %vm965_vm2, %v934_v45  ;;  %1687 = vmatprep.mubr.msk.f32.mxu1 %vm1013_vm3, %v988_v28 }
 0x424   :  { %1688 = vmatmul.mubr.msk.f32.gmra.mrb[22].mxu1 %vm1013_vm3, %v989_v23 }
 0x429   :  { %v940_v14 = vpop.permute.xlu1 %939  ;;  %v991_v0 = vld [vmem:[#allocation2 + $0x48] sm:$0xff] }
 0x42a   :  { %977 = vst.msk [vmem:[#allocation2 + $0x58] sm:$0xff] %vm965_vm2, %v940_v14  ;;  %v938_v39 = vpop.permute.xlu0 %937  ;;  %v990_v63 = vld [vmem:[#allocation2 + $0x40] sm:$0xff] }
 0x42b   :  { %976 = vst.msk [vmem:[#allocation2 + $0x50] sm:$0xff] %vm965_vm2, %v938_v39  ;;  %1690 = vmatprep.mubr.msk.f32.mxu1 %vm1013_vm3, %v990_v63 }
 0x42c   :  { %1691 = vmatmul.mubr.msk.f32.gmra.mrb[24].mxu1 %vm1013_vm3, %v991_v0 }
 0x431   :  { %v944_v2 = vpop.permute.xlu1 %943  ;;  %v993_v5 = vld [vmem:[#allocation2 + $0x58] sm:$0xff] }
 0x432   :  { %979 = vst.msk [vmem:[#allocation2 + $0x68] sm:$0xff] %vm965_vm2, %v944_v2  ;;  %v942_v3 = vpop.permute.xlu0 %941  ;;  %v992_v4 = vld [vmem:[#allocation2 + $0x50] sm:$0xff] }
 0x433   :  { %978 = vst.msk [vmem:[#allocation2 + $0x60] sm:$0xff] %vm965_vm2, %v942_v3  ;;  %1693 = vmatprep.mubr.msk.f32.mxu1 %vm1013_vm3, %v992_v4 }
 0x434   :  { %1694 = vmatmul.mubr.msk.f32.gmra.mrb[26].mxu1 %vm1013_vm3, %v993_v5 }
 0x439   :  { %v948_v1 = vpop.permute.xlu1 %947  ;;  %v995_v43 = vld [vmem:[#allocation2 + $0x68] sm:$0xff] }
 0x43a   :  { %981 = vst.msk [vmem:[#allocation2 + $0x78] sm:$0xff] %vm965_vm2, %v948_v1  ;;  %v946_v15 = vpop.permute.xlu0 %945  ;;  %v994_v31 = vld [vmem:[#allocation2 + $0x60] sm:$0xff] }
 0x43b   :  { %980 = vst.msk [vmem:[#allocation2 + $0x70] sm:$0xff] %vm965_vm2, %v946_v15  ;;  %1696 = vmatprep.mubr.msk.f32.mxu1 %vm1013_vm3, %v994_v31 }
 0x43c   :  { %1697 = vmatmul.mubr.msk.f32.gmra.mrb[28].mxu1 %vm1013_vm3, %v995_v43 }
 0x441   :  { %v997_v50 = vld [vmem:[#allocation2 + $0x78] sm:$0xff] }
 0x442   :  { %v996_v44 = vld [vmem:[#allocation2 + $0x70] sm:$0xff] }
 0x443   :  { %1699 = vmatprep.mubr.msk.f32.mxu1 %vm1013_vm3, %v996_v44 }
 0x444   :  { %1700 = vmatmul.mubr.msk.f32.gmra.mrb[30].mxu1 %vm1013_vm3, %v997_v50 }
 0x4e0   :  { %v1680_v62 = vpop.f32.mrb[16].mxu1 }
 0x4e1   :  { %v1134_v34 = vadd.f32 %v1680_v62, %v1492_v60  ;;  %v1128_v56 = vpop.f32.mrb[17].mxu1 }
 0x4e2   :  { %v1129_v17 = vadd.f32 %v1492_v60, %v1128_v56 }
 0x4e3   :  { %v1208_v26 = vmax.f32 %v1134_v34, 0.0 }
 0x4e4   :  { %v1207_v18 = vmax.f32 %v1129_v17, 0.0 }
 0x4e6   :  { %1706 = vmatprep.mubr.msk.f32.mxu0 %vm1225_vm4, %v1207_v18 }
 0x4e7   :  { %1707 = vmatmul.mubr.msk.f32.vlgmr.msra.gmra.mrb[16].mxu0 %vm1225_vm4, %v1208_v26 }
 0x4ea   :  { %v1683_v37 = vpop.f32.mrb[18].mxu1 }
 0x4eb   :  { %v1144_v49 = vadd.f32 %v1683_v37, %v1492_v60  ;;  %v1138_v9 = vpop.f32.mrb[19].mxu1 }
 0x4ec   :  { %v1139_v19 = vadd.f32 %v1492_v60, %v1138_v9 }
 0x4ed   :  { %v1210_v6 = vmax.f32 %v1144_v49, 0.0 }
 0x4ee   :  { %v1209_v27 = vmax.f32 %v1139_v19, 0.0 }
 0x4ef   :  { %v1686_v32 = vpop.f32.mrb[20].mxu1 }
 0x4f0   :  { %v1154_v29 = vadd.f32 %v1686_v32, %v1492_v60  ;;  %v1148_v30 = vpop.f32.mrb[21].mxu1  ;;  %1709 = vmatprep.mubr.msk.f32.mxu0 %vm1225_vm4, %v1209_v27 }
 0x4f1   :  { %v1149_v35 = vadd.f32 %v1492_v60, %v1148_v30  ;;  %1710 = vmatmul.mubr.msk.f32.gmra.mrb[18].mxu0 %vm1225_vm4, %v1210_v6 }
 0x4f2   :  { %v1212_v7 = vmax.f32 %v1154_v29, 0.0 }
 0x4f3   :  { %v1211_v36 = vmax.f32 %v1149_v35, 0.0 }
 0x4f5   :  { %1712 = vmatprep.mubr.msk.f32.mxu0 %vm1225_vm4, %v1211_v36 }
 0x4f6   :  { %1713 = vmatmul.mubr.msk.f32.gmra.mrb[20].mxu0 %vm1225_vm4, %v1212_v7 }
 0x4f7   :  { %v1689_v20 = vpop.f32.mrb[22].mxu1 }
 0x4f8   :  { %v1164_v38 = vadd.f32 %v1689_v20, %v1492_v60  ;;  %v1158_v22 = vpop.f32.mrb[23].mxu1 }
 0x4f9   :  { %v1159_v42 = vadd.f32 %v1492_v60, %v1158_v22 }
 0x4fa   :  { %v1214_v40 = vmax.f32 %v1164_v38, 0.0 }
 0x4fb   :  { %v1213_v59 = vmax.f32 %v1159_v42, 0.0 }
 0x4fd   :  { %1715 = vmatprep.mubr.msk.f32.mxu0 %vm1225_vm4, %v1213_v59 }
 0x4fe   :  { %1716 = vmatmul.mubr.msk.f32.gmra.mrb[22].mxu0 %vm1225_vm4, %v1214_v40 }
 0x4ff   :  { %v1692_v21 = vpop.f32.mrb[24].mxu1 }
 0x500   :  { %v1174_v46 = vadd.f32 %v1692_v21, %v1492_v60  ;;  %v1168_v54 = vpop.f32.mrb[25].mxu1 }
 0x501   :  { %v1169_v47 = vadd.f32 %v1492_v60, %v1168_v54 }
 0x502   :  { %v1216_v51 = vmax.f32 %v1174_v46, 0.0 }
 0x503   :  { %v1215_v48 = vmax.f32 %v1169_v47, 0.0 }
 0x505   :  { %1718 = vmatprep.mubr.msk.f32.mxu0 %vm1225_vm4, %v1215_v48 }
 0x506   :  { %1719 = vmatmul.mubr.msk.f32.gmra.mrb[24].mxu0 %vm1225_vm4, %v1216_v51 }
 0x507   :  { %v1695_v52 = vpop.f32.mrb[26].mxu1 }
 0x508   :  { %v1184_v13 = vadd.f32 %v1695_v52, %v1492_v60  ;;  %v1178_v33 = vpop.f32.mrb[27].mxu1 }
 0x509   :  { %v1179_v41 = vadd.f32 %v1492_v60, %v1178_v33 }
 0x50a   :  { %v1218_v8 = vmax.f32 %v1184_v13, 0.0 }
 0x50b   :  { %v1217_v24 = vmax.f32 %v1179_v41, 0.0 }
 0x50d   :  { %1721 = vmatprep.mubr.msk.f32.mxu0 %vm1225_vm4, %v1217_v24 }
 0x50e   :  { %1722 = vmatmul.mubr.msk.f32.gmra.mrb[26].mxu0 %vm1225_vm4, %v1218_v8 }
 0x50f   :  { %v1698_v10 = vpop.f32.mrb[28].mxu1 }
 0x510   :  { %v1194_v53 = vadd.f32 %v1698_v10, %v1492_v60  ;;  %v1188_v55 = vpop.f32.mrb[29].mxu1 }
 0x511   :  { %v1189_v57 = vadd.f32 %v1492_v60, %v1188_v55 }
 0x512   :  { %v1220_v61 = vmax.f32 %v1194_v53, 0.0 }
 0x513   :  { %v1219_v58 = vmax.f32 %v1189_v57, 0.0 }
 0x515   :  { %1724 = vmatprep.mubr.msk.f32.mxu0 %vm1225_vm4, %v1219_v58 }
 0x516   :  { %1725 = vmatmul.mubr.msk.f32.gmra.mrb[28].mxu0 %vm1225_vm4, %v1220_v61 }
 0x517   :  { %v1701_v25 = vpop.f32.mrb[30].mxu1 }
 0x518   :  { %v1204_v45 = vadd.f32 %v1701_v25, %v1492_v60  ;;  %v1198_v28 = vpop.f32.mrb[31].mxu1 }
 0x519   :  { %v1199_v23 = vadd.f32 %v1492_v60, %v1198_v28 }
 0x51a   :  { %v1222_v39 = vmax.f32 %v1204_v45, 0.0 }
 0x51b   :  { %v1221_v14 = vmax.f32 %v1199_v23, 0.0 }
 0x51d   :  { %1727 = vmatprep.mubr.msk.f32.mxu0 %vm1225_vm4, %v1221_v14 }
 0x51e   :  { %1728 = vmatmul.mubr.msk.f32.gmra.mrb[30].mxu0 %vm1225_vm4, %v1222_v39 }
 0x5ba   :  { %v1708_v63 = vpop.f32.mrb[16].mxu0 }
 0x5bb   :  { %1437 = vst.msk [vmem:[%s2733_s8 + $0x8] sm:$0xff] %vm1435_vm5, %v1708_v63  ;;  %v1340_v0 = vpop.f32.mrb[17].mxu0 }
 0x5bc   :  { %1436 = vst.msk [vmem:[%s2733_s8] sm:$0xff] %vm1435_vm5, %v1340_v0 }
 0x5c4   :  { %v1711_v2 = vpop.f32.mrb[18].mxu0 }
 0x5c5   :  { %1439 = vst.msk [vmem:[%s2733_s8 + $0x18] sm:$0xff] %vm1435_vm5, %v1711_v2  ;;  %v1350_v3 = vpop.f32.mrb[19].mxu0 }
 0x5c6   :  { %1438 = vst.msk [vmem:[%s2733_s8 + $0x10] sm:$0xff] %vm1435_vm5, %v1350_v3 }
 0x5c9   :  { %v1714_v4 = vpop.f32.mrb[20].mxu0 }
 0x5ca   :  { %1441 = vst.msk [vmem:[%s2733_s8 + $0x28] sm:$0xff] %vm1435_vm5, %v1714_v4  ;;  %v1360_v5 = vpop.f32.mrb[21].mxu0 }
 0x5cb   :  { %1440 = vst.msk [vmem:[%s2733_s8 + $0x20] sm:$0xff] %vm1435_vm5, %v1360_v5 }
 0x5d1   :  { %v1717_v1 = vpop.f32.mrb[22].mxu0 }
 0x5d2   :  { %1443 = vst.msk [vmem:[%s2733_s8 + $0x38] sm:$0xff] %vm1435_vm5, %v1717_v1  ;;  %v1370_v15 = vpop.f32.mrb[23].mxu0 }
 0x5d3   :  { %1442 = vst.msk [vmem:[%s2733_s8 + $0x30] sm:$0xff] %vm1435_vm5, %v1370_v15 }
 0x5d9   :  { %v1720_v31 = vpop.f32.mrb[24].mxu0 }
 0x5da   :  { %1445 = vst.msk [vmem:[%s2733_s8 + $0x48] sm:$0xff] %vm1435_vm5, %v1720_v31  ;;  %v1380_v43 = vpop.f32.mrb[25].mxu0 }
 0x5db   :  { %1444 = vst.msk [vmem:[%s2733_s8 + $0x40] sm:$0xff] %vm1435_vm5, %v1380_v43 }
 0x5e1   :  { %v1723_v44 = vpop.f32.mrb[26].mxu0 }
 0x5e2   :  { %1447 = vst.msk [vmem:[%s2733_s8 + $0x58] sm:$0xff] %vm1435_vm5, %v1723_v44  ;;  %v1390_v50 = vpop.f32.mrb[27].mxu0 }
 0x5e3   :  { %1446 = vst.msk [vmem:[%s2733_s8 + $0x50] sm:$0xff] %vm1435_vm5, %v1390_v50 }
 0x5e9   :  { %v1726_v11 = vpop.f32.mrb[28].mxu0 }
 0x5ea   :  { %1449 = vst.msk [vmem:[%s2733_s8 + $0x68] sm:$0xff] %vm1435_vm5, %v1726_v11  ;;  %v1400_v12 = vpop.f32.mrb[29].mxu0 }
 0x5eb   :  { %1448 = vst.msk [vmem:[%s2733_s8 + $0x60] sm:$0xff] %vm1435_vm5, %v1400_v12 }
 0x5f1   :  { %v1729_v16 = vpop.f32.mrb[30].mxu0 }
 0x5f2   :  { %1451 = vst.msk [vmem:[%s2733_s8 + $0x78] sm:$0xff] %vm1435_vm5, %v1729_v16  ;;  %v1410_v60 = vpop.f32.mrb[31].mxu0 }
 0x5f3   :  { %1450 = vst.msk [vmem:[%s2733_s8 + $0x70] sm:$0xff] %vm1435_vm5, %v1410_v60 }

</bundles_post_ra>
